<compile_context>
chip_gen: v5e
topology: v5e:2x2
jax: 0.10.0
libtpu: 0.0.40
codegen_flags: <defaults>
</compile_context>

<pallas_src>
import functools

import jax
import jax.numpy as jnp
from jax import lax
from jax.experimental import pallas as pl
from jax.experimental.pallas import tpu as pltpu

_LOG2 = 0.6931471805599453  # shifted_softplus(x) = softplus(x) - log(2)


def _node2prop2_kernel(x_ref, w1_ref, b1_ref, w2_ref, batch_ref, out_ref, acc_ref, *, n_batch):
    step = pl.program_id(0)

    # ---- init per-graph accumulator (n_batch, hidden) on first tile ----
    @pl.when(step == 0)
    def _():
        acc_ref[...] = jnp.zeros_like(acc_ref)

    # ---- Dense 1 + shifted softplus (f32 accumulate on MXU) ----
    x = x_ref[...]                                                     # (TILE_N, in_dim) f32
    h = jnp.dot(x, w1_ref[...], preferred_element_type=jnp.float32)    # (TILE_N, hidden)
    h = h + b1_ref[...]                                                # b1 is (1, hidden)
    h = jax.nn.softplus(h) - jnp.float32(_LOG2)

    # ---- segment-sum of h via lane-dense one-hot matmul (no transpose) ----
    tile_n = x.shape[0]
    seg_ids = lax.broadcasted_iota(jnp.int32, (n_batch, tile_n), 0)    # row index = graph id
    onehot = (batch_ref[...] == seg_ids).astype(jnp.float32)           # (n_batch, TILE_N)
    acc_ref[...] += jnp.dot(onehot, h, preferred_element_type=jnp.float32)

    # ---- apply Dense 2 (no bias) once, on the final tile ----
    @pl.when(step == pl.num_programs(0) - 1)
    def _():
        out_ref[...] = jnp.dot(
            acc_ref[...], w2_ref[...], preferred_element_type=jnp.float32
        ).astype(out_ref.dtype)


def node2prop2_forward(x, w1, b1, w2, batch, n_batch, *, tile_n=512):
    """x: (n_node, in_dim) f32; batch: (n_node,) int; returns (n_batch, out_dim) f32.

    aggr='add', scaler=None (module defaults).
    """
    n_node, in_dim = x.shape
    hidden = w1.shape[1]
    out_dim = w2.shape[1]

    # Pad the node axis to a multiple of tile_n.  Padded rows get batch index -1,
    # which matches no segment -> exact-zero contribution to the accumulator.
    num_tiles = -(-n_node // tile_n)
    n_pad = num_tiles * tile_n
    batch = batch.astype(jnp.int32)
    if n_pad != n_node:
        x = jnp.pad(x, ((0, n_pad - n_node), (0, 0)))
        batch = jnp.pad(batch, (0, n_pad - n_node), constant_values=-1)

    batch_row = batch.reshape(1, n_pad)   # lane-dense layout: nodes on the lane axis
    b1_row = b1.reshape(1, hidden)

    kernel = functools.partial(_node2prop2_kernel, n_batch=n_batch)
    return pl.pallas_call(
        kernel,
        out_shape=jax.ShapeDtypeStruct((n_batch, out_dim), jnp.float32),
        grid=(num_tiles,),
        in_specs=[
            pl.BlockSpec((tile_n, in_dim), lambda i: (i, 0)),   # x: streamed node tiles
            pl.BlockSpec((in_dim, hidden), lambda i: (0, 0)),   # W1: resident
            pl.BlockSpec((1, hidden), lambda i: (0, 0)),        # b1: resident
            pl.BlockSpec((hidden, out_dim), lambda i: (0, 0)),  # W2: resident
            pl.BlockSpec((1, tile_n), lambda i: (0, i)),        # batch: streamed (1, TILE_N)
        ],
        out_specs=pl.BlockSpec((n_batch, out_dim), lambda i: (0, 0)),
        scratch_shapes=[pltpu.VMEM((n_batch, hidden), jnp.float32)],
        compiler_params=pltpu.CompilerParams(
            dimension_semantics=("arbitrary",),          # reduction over node tiles
            vmem_limit_bytes=32 * 1024 * 1024,           # explicit: fits v5e/v6e/v7x budgets
        ),
    )(x, w1, b1_row, w2, batch_row)
    # TODO(synk): optional bf16 cast of x/W1 (v6e/v7x MXU speedup) and a 2-TC partial
    # output split on v7x are left out to keep exact f32 forward semantics.


def _reference(x, w1, b1, w2, batch, n_batch):
    h = jax.nn.softplus(x @ w1 + b1) - jnp.log(2.0)
    y = h @ w2
    return jax.ops.segment_sum(y, batch, num_segments=n_batch)


if __name__ == "__main__":
    # ---- Small deterministic test, shapes consistent with the module defaults ----
    #   n_node=16, in_dim=32, hidden_dim=128 (default), out_dim=1 (default),
    #   aggr='add' (default), scaler=None (default).
    n_node, in_dim, hidden_dim, out_dim, n_batch = 16, 32, 128, 1, 2

    key = jax.random.PRNGKey(0)
    kx, kw1, kb1, kw2 = jax.random.split(key, 4)
    x = jax.random.normal(kx, (n_node, in_dim), dtype=jnp.float32)
    w1 = jax.random.normal(kw1, (in_dim, hidden_dim), dtype=jnp.float32) * 0.1
    b1 = jax.random.normal(kb1, (hidden_dim,), dtype=jnp.float32) * 0.01
    w2 = jax.random.normal(kw2, (hidden_dim, out_dim), dtype=jnp.float32) * 0.1
    batch = jnp.concatenate([jnp.zeros((8,), jnp.int32), jnp.ones((8,), jnp.int32)])

    out = node2prop2_forward(x, w1, b1, w2, batch, n_batch)
    out = jax.block_until_ready(out)
    ref = _reference(x, w1, b1, w2, batch, n_batch)
    assert out.shape == (n_batch, out_dim)
    assert jnp.allclose(out, ref, atol=1e-4, rtol=1e-4), (out, ref)

    # ---- Multi-tile test: exercises grid accumulation + ragged padding ----
    n_node2, n_batch2, out_dim2 = 300, 3, 2
    k2 = jax.random.PRNGKey(1)
    kx2, kb2, kw22 = jax.random.split(k2, 3)
    x2 = jax.random.normal(kx2, (n_node2, in_dim), dtype=jnp.float32)
    batch2 = jax.random.randint(kb2, (n_node2,), 0, n_batch2, dtype=jnp.int32)
    w2b = jax.random.normal(kw22, (hidden_dim, out_dim2), dtype=jnp.float32) * 0.1

    out2 = node2prop2_forward(x2, w1, b1, w2b, batch2, n_batch2, tile_n=128)
    out2 = jax.block_until_ready(out2)
    ref2 = _reference(x2, w1, b1, w2b, batch2, n_batch2)
    assert out2.shape == (n_batch2, out_dim2)
    assert jnp.allclose(out2, ref2, atol=1e-3, rtol=1e-4), (out2, ref2)

    print("KERNEL_OK")
</pallas_src>

<mosaic_0001>
module attributes {stable_mosaic.version = 11 : i64} {
  func.func @_node2prop2_kernel(%arg0: i32, %arg1: memref<512x32xf32, #tpu.memory_space<vmem>>, %arg2: memref<32x128xf32, #tpu.memory_space<vmem>>, %arg3: memref<1x128xf32, #tpu.memory_space<vmem>>, %arg4: memref<128x1xf32, #tpu.memory_space<vmem>>, %arg5: memref<1x512xi32, #tpu.memory_space<vmem>>, %arg6: memref<2x1xf32, #tpu.memory_space<vmem>>, %arg7: memref<2x128xf32, #tpu.memory_space<vmem>>) attributes {dimension_semantics = [#tpu.dimension_semantics<arbitrary>], iteration_bounds = array<i64: 1>, scalar_prefetch = 0 : i64, scratch_operands = 1 : i64, tpu.core_type = #tpu.core_type<tc>, window_params = [{transform_indices = @transform_0, window_bounds = array<i64: 512, 32>}, {pipeline_mode = #tpu.pipeline_mode<synchronous>, transform_indices = @transform_1, window_bounds = array<i64: 32, 128>}, {pipeline_mode = #tpu.pipeline_mode<synchronous>, transform_indices = @transform_2, window_bounds = array<i64: 1, 128>}, {pipeline_mode = #tpu.pipeline_mode<synchronous>, transform_indices = @transform_3, window_bounds = array<i64: 128, 1>}, {transform_indices = @transform_4, window_bounds = array<i64: 1, 512>}, {pipeline_mode = #tpu.pipeline_mode<synchronous>, transform_indices = @transform_5, window_bounds = array<i64: 2, 1>}]} {
    %c0_i32 = arith.constant 0 : i32
    %0 = arith.cmpi eq, %arg0, %c0_i32 : i32
    %1 = arith.extui %0 : i1 to i32
    %c0_i32_0 = arith.constant 0 : i32
    %2 = arith.cmpi ne, %1, %c0_i32_0 : i32
    scf.if %2 {
      %cst_18 = arith.constant 0.000000e+00 : f32
      %38 = vector.broadcast %cst_18 : f32 to vector<2x128xf32>
      %c0_19 = arith.constant 0 : index
      %c0_20 = arith.constant 0 : index
      %39 = vector.load %arg7[%c0_19, %c0_20] : memref<2x128xf32, #tpu.memory_space<vmem>>, vector<2x128xf32>
      tpu.vector_store %arg7[%c0_19, %c0_20], %38 {strides = array<i32>} : memref<2x128xf32, #tpu.memory_space<vmem>>, vector<2x128xf32>,
    } else {
    }
    %c0 = arith.constant 0 : index
    %c0_1 = arith.constant 0 : index
    %3 = vector.load %arg1[%c0, %c0_1] : memref<512x32xf32, #tpu.memory_space<vmem>>, vector<512x32xf32>
    %c0_2 = arith.constant 0 : index
    %c0_3 = arith.constant 0 : index
    %4 = vector.load %arg2[%c0_2, %c0_3] : memref<32x128xf32, #tpu.memory_space<vmem>>, vector<32x128xf32>
    %cst = arith.constant dense<0.000000e+00> : vector<512x128xf32>
    %5 = tpu.matmul %3, %4, %cst {dimension_numbers = #tpu.dot_dimension_numbers<[1], [0], [0], [1], [0, 0, 1, 1], [], []>} : vector<512x32xf32>, vector<32x128xf32>, vector<512x128xf32> -> vector<512x128xf32>
    %c0_4 = arith.constant 0 : index
    %c0_5 = arith.constant 0 : index
    %6 = vector.load %arg3[%c0_4, %c0_5] : memref<1x128xf32, #tpu.memory_space<vmem>>, vector<1x128xf32>
    %7 = vector.broadcast %6 : vector<1x128xf32> to vector<512x128xf32>
    %8 = arith.addf %5, %7 : vector<512x128xf32>
    %cst_6 = arith.constant 0.000000e+00 : f32
    %9 = vector.broadcast %cst_6 : f32 to vector<512x128xf32>
    %10 = arith.maximumf %8, %9 : vector<512x128xf32>
    %11 = vector.broadcast %cst_6 : f32 to vector<512x128xf32>
    %12 = arith.subf %8, %11 : vector<512x128xf32>
    %13 = arith.cmpf one, %12, %12 : vector<512x128xf32>
    %14 = vector.broadcast %cst_6 : f32 to vector<512x128xf32>
    %15 = arith.addf %8, %14 : vector<512x128xf32>
    %16 = math.absf %12 : vector<512x128xf32>
    %cst_7 = arith.constant 0.000000e+00 : f32
    %17 = vector.broadcast %cst_7 : f32 to vector<512x128xf32>
    %18 = arith.subf %17, %16 : vector<512x128xf32>
    %19 = math.exp %18 : vector<512x128xf32>
    %20 = math.log1p %19 : vector<512x128xf32>
    %21 = arith.addf %10, %20 : vector<512x128xf32>
    %22 = arith.select %13, %15, %21 : vector<512x128xi1>, vector<512x128xf32>
    %cst_8 = arith.constant 0.693147182 : f32
    %23 = vector.broadcast %cst_8 : f32 to vector<512x128xf32>
    %24 = arith.subf %22, %23 : vector<512x128xf32>
    %25 = tpu.iota {dimensions = array<i32: 0>} : vector<2x512xi32>
    %c0_9 = arith.constant 0 : index
    %c0_10 = arith.constant 0 : index
    %26 = vector.load %arg5[%c0_9, %c0_10] : memref<1x512xi32, #tpu.memory_space<vmem>>, vector<1x512xi32>
    %27 = vector.broadcast %26 : vector<1x512xi32> to vector<2x512xi32>
    %28 = arith.cmpi eq, %27, %25 : vector<2x512xi32>
    %29 = arith.extui %28 : vector<2x512xi1> to vector<2x512xi32>
    %30 = arith.sitofp %29 : vector<2x512xi32> to vector<2x512xf32>
    %c0_11 = arith.constant 0 : index
    %c0_12 = arith.constant 0 : index
    %31 = vector.load %arg7[%c0_11, %c0_12] : memref<2x128xf32, #tpu.memory_space<vmem>>, vector<2x128xf32>
    %cst_13 = arith.constant dense<0.000000e+00> : vector<2x128xf32>
    %32 = tpu.matmul %30, %24, %cst_13 {dimension_numbers = #tpu.dot_dimension_numbers<[1], [0], [0], [1], [0, 0, 1, 1], [], []>} : vector<2x512xf32>, vector<512x128xf32>, vector<2x128xf32> -> vector<2x128xf32>
    %33 = arith.addf %31, %32 : vector<2x128xf32>
    %c0_14 = arith.constant 0 : index
    %c0_15 = arith.constant 0 : index
    %34 = vector.load %arg7[%c0_14, %c0_15] : memref<2x128xf32, #tpu.memory_space<vmem>>, vector<2x128xf32>
    tpu.vector_store %arg7[%c0_14, %c0_15], %33 {strides = array<i32>} : memref<2x128xf32, #tpu.memory_space<vmem>>, vector<2x128xf32>,
    %c0_i32_16 = arith.constant 0 : i32
    %35 = arith.cmpi eq, %arg0, %c0_i32_16 : i32
    %36 = arith.extui %35 : i1 to i32
    %c0_i32_17 = arith.constant 0 : i32
    %37 = arith.cmpi ne, %36, %c0_i32_17 : i32
    scf.if %37 {
      %c0_18 = arith.constant 0 : index
      %c0_19 = arith.constant 0 : index
      %38 = vector.load %arg7[%c0_18, %c0_19] : memref<2x128xf32, #tpu.memory_space<vmem>>, vector<2x128xf32>
      %c0_20 = arith.constant 0 : index
      %c0_21 = arith.constant 0 : index
      %39 = vector.load %arg4[%c0_20, %c0_21] : memref<128x1xf32, #tpu.memory_space<vmem>>, vector<128x1xf32>
      %cst_22 = arith.constant dense<0.000000e+00> : vector<2x1xf32>
      %40 = tpu.matmul %38, %39, %cst_22 {dimension_numbers = #tpu.dot_dimension_numbers<[1], [0], [0], [1], [0, 0, 1, 1], [], []>} : vector<2x128xf32>, vector<128x1xf32>, vector<2x1xf32> -> vector<2x1xf32>
      %c0_23 = arith.constant 0 : index
      %c0_24 = arith.constant 0 : index
      %41 = vector.load %arg6[%c0_23, %c0_24] : memref<2x1xf32, #tpu.memory_space<vmem>>, vector<2x1xf32>
      tpu.vector_store %arg6[%c0_23, %c0_24], %40 {strides = array<i32>} : memref<2x1xf32, #tpu.memory_space<vmem>>, vector<2x1xf32>,
    } else {
    }
    return
  }
  func.func @transform_0(%arg0: i32) -> (i32, i32) {
    %c0_i32 = arith.constant 0 : i32
    %c0_i32_0 = arith.constant 0 : i32
    return %arg0, %c0_i32 : i32, i32
  }
  func.func @transform_1(%arg0: i32) -> (i32, i32) {
    %c0_i32 = arith.constant 0 : i32
    %c0_i32_0 = arith.constant 0 : i32
    %c0_i32_1 = arith.constant 0 : i32
    return %c0_i32, %c0_i32_0 : i32, i32
  }
  func.func @transform_2(%arg0: i32) -> (i32, i32) {
    %c0_i32 = arith.constant 0 : i32
    %c0_i32_0 = arith.constant 0 : i32
    %c0_i32_1 = arith.constant 0 : i32
    return %c0_i32, %c0_i32_0 : i32, i32
  }
  func.func @transform_3(%arg0: i32) -> (i32, i32) {
    %c0_i32 = arith.constant 0 : i32
    %c0_i32_0 = arith.constant 0 : i32
    %c0_i32_1 = arith.constant 0 : i32
    return %c0_i32, %c0_i32_0 : i32, i32
  }
  func.func @transform_4(%arg0: i32) -> (i32, i32) {
    %c0_i32 = arith.constant 0 : i32
    %c0_i32_0 = arith.constant 0 : i32
    return %c0_i32, %arg0 : i32, i32
  }
  func.func @transform_5(%arg0: i32) -> (i32, i32) {
    %c0_i32 = arith.constant 0 : i32
    %c0_i32_0 = arith.constant 0 : i32
    %c0_i32_1 = arith.constant 0 : i32
    return %c0_i32, %c0_i32_0 : i32, i32
  }
}

</mosaic_0001>

<bundles_post_ra>
// kernel: tpu_custom_call.1
= control target key start
LH: loop header
LB: loop body
LE: loop exit
PB: predicated region body
PF: predicated region fallthrough
CT: control target
= control target key end

     0   :  { %vm97_vm0 = vcmask 261120   ;;  %s3970_s1 = inlined_call_operand.vmem [shape: f32[32,128], index: 1, kind: input, shape index: {}]   ;;  %s3971_s0 = inlined_call_operand.vmem [shape: f32[512,32], index: 0, kind: input, shape index: {}]   ;;  %s3972_s2 = inlined_call_operand.vmem [shape: f32[1,128], index: 2, kind: input, shape index: {}]   ;;  %s3973_s3 = inlined_call_operand.vmem [shape: f32[128,1], index: 3, kind: input, shape index: {}]   ;;  %s3974_s4 = inlined_call_operand.vmem [shape: s32[1,512], index: 4, kind: input, shape index: {}]   ;;  %s3975_s5 = inlined_call_operand.vmem [shape: f32[2,1], index: 5, kind: output, shape index: {}]  }
   0x1   :  { %v92_v0 = vld [vmem:[%s3970_s1 + $0x18] sm:$0xff]  ;;  %v91_v1 = vld [vmem:[%s3970_s1 + $0x10] sm:$0xff]  ;;  %v90_v2 = vld [vmem:[%s3970_s1 + $0x8] sm:$0xff] }
   0x2   :  { %302 = vmatpush.msra.mxu0 %v92_v0  ;;  %1999 = vmatpush.msra.mxu1 %v92_v0  ;;  %v89_v3 = vld [vmem:[%s3970_s1] sm:$0xff]  ;;  %v46_v5 = vld [vmem:[%s3971_s0 + $0xa8] sm:$0xff]  ;;  %v60_v6 = vld [vmem:[%s3971_s0 + $0x118] sm:$0xff] }
   0x3   :  { %2000 = vmatpush.msra.mxu2 %v92_v0  ;;  %2001 = vmatpush.msra.mxu3 %v92_v0  ;;  %v25_v4 = vld [vmem:[%s3971_s0] sm:$0xff]  ;;  %v70_v7 = vld [vmem:[%s3971_s0 + $0x168] sm:$0xff]  ;;  %v47_v9 = vld [vmem:[%s3971_s0 + $0xb0] sm:$0xff] }
   0x4   :  { %303 = vmatpush.msra.mxu0 %v91_v1  ;;  %2002 = vmatpush.msra.mxu1 %v91_v1  ;;  %v26_v8 = vld [vmem:[%s3971_s0 + $0x8] sm:$0xff]  ;;  %v61_v10 = vld [vmem:[%s3971_s0 + $0x120] sm:$0xff]  ;;  %v71_v11 = vld [vmem:[%s3971_s0 + $0x170] sm:$0xff] }
   0x5   :  { %2003 = vmatpush.msra.mxu2 %v91_v1  ;;  %2004 = vmatpush.msra.mxu3 %v91_v1  ;;  %v27_v12 = vld [vmem:[%s3971_s0 + $0x10] sm:$0xff]  ;;  %v48_v13 = vld [vmem:[%s3971_s0 + $0xb8] sm:$0xff]  ;;  %v62_v14 = vld [vmem:[%s3971_s0 + $0x128] sm:$0xff] }
   0x6   :  { %304 = vmatpush.msra.mxu0 %v90_v2  ;;  %2005 = vmatpush.msra.mxu1 %v90_v2  ;;  %v72_v15 = vld [vmem:[%s3971_s0 + $0x178] sm:$0xff]  ;;  %v49_v17 = vld [vmem:[%s3971_s0 + $0xc0] sm:$0xff]  ;;  %v63_v18 = vld [vmem:[%s3971_s0 + $0x130] sm:$0xff] }
   0x7   :  { %2006 = vmatpush.msra.mxu2 %v90_v2  ;;  %2007 = vmatpush.msra.mxu3 %v90_v2  ;;  %v28_v16 = vld [vmem:[%s3971_s0 + $0x18] sm:$0xff]  ;;  %v73_v19 = vld [vmem:[%s3971_s0 + $0x180] sm:$0xff]  ;;  %v50_v21 = vld [vmem:[%s3971_s0 + $0xc8] sm:$0xff] }
   0x8   :  { %305 = vmatpush.msra.mxu0 %v89_v3  ;;  %2008 = vmatpush.msra.mxu1 %v89_v3  ;;  %v29_v20 = vld [vmem:[%s3971_s0 + $0x20] sm:$0xff]  ;;  %v64_v22 = vld [vmem:[%s3971_s0 + $0x138] sm:$0xff]  ;;  %v74_v23 = vld [vmem:[%s3971_s0 + $0x188] sm:$0xff] }
   0x9   :  { %2009 = vmatpush.msra.mxu2 %v89_v3  ;;  %2010 = vmatpush.msra.mxu3 %v89_v3  ;;  %v30_v24 = vld [vmem:[%s3971_s0 + $0x28] sm:$0xff]  ;;  %v51_v25 = vld [vmem:[%s3971_s0 + $0xd0] sm:$0xff]  ;;  %v65_v26 = vld [vmem:[%s3971_s0 + $0x140] sm:$0xff] }
   0xa   :  { %1863 = vmatmul.msk.f32.vlgmr.msra.gmra.mxu0 %vm97_vm0, %v25_v4  ;;  %1884 = vmatmul.msk.f32.vlgmr.msra.gmra.mxu1 %vm97_vm0, %v46_v5  ;;  %v75_v27 = vld [vmem:[%s3971_s0 + $0x190] sm:$0xff]  ;;  %v52_v29 = vld [vmem:[%s3971_s0 + $0xd8] sm:$0xff]  ;;  %v66_v30 = vld [vmem:[%s3971_s0 + $0x148] sm:$0xff] }
   0xb   :  { %1898 = vmatmul.msk.f32.vlgmr.msra.gmra.mxu2 %vm97_vm0, %v60_v6  ;;  %1908 = vmatmul.msk.f32.vlgmr.msra.gmra.mxu3 %vm97_vm0, %v70_v7  ;;  %v31_v28 = vld [vmem:[%s3971_s0 + $0x30] sm:$0xff]  ;;  %v76_v31 = vld [vmem:[%s3971_s0 + $0x198] sm:$0xff]  ;;  %v53_v33 = vld [vmem:[%s3971_s0 + $0xe0] sm:$0xff] }
   0xc   :  { %v32_v32 = vld [vmem:[%s3971_s0 + $0x38] sm:$0xff]  ;;  %v67_v34 = vld [vmem:[%s3971_s0 + $0x150] sm:$0xff]  ;;  %v77_v35 = vld [vmem:[%s3971_s0 + $0x1a0] sm:$0xff] }
   0xd   :  { %v33_v36 = vld [vmem:[%s3971_s0 + $0x40] sm:$0xff]  ;;  %v54_v37 = vld [vmem:[%s3971_s0 + $0xe8] sm:$0xff]  ;;  %v68_v38 = vld [vmem:[%s3971_s0 + $0x158] sm:$0xff] }
   0xe   :  { %v78_v39 = vld [vmem:[%s3971_s0 + $0x1a8] sm:$0xff]  ;;  %v55_v41 = vld [vmem:[%s3971_s0 + $0xf0] sm:$0xff]  ;;  %v69_v42 = vld [vmem:[%s3971_s0 + $0x160] sm:$0xff] }
   0xf   :  { %v34_v40 = vld [vmem:[%s3971_s0 + $0x48] sm:$0xff]  ;;  %v79_v43 = vld [vmem:[%s3971_s0 + $0x1b0] sm:$0xff]  ;;  %v56_v45 = vld [vmem:[%s3971_s0 + $0xf8] sm:$0xff] }
  0x10   :  { %v35_v44 = vld [vmem:[%s3971_s0 + $0x50] sm:$0xff]  ;;  %v80_v46 = vld [vmem:[%s3971_s0 + $0x1b8] sm:$0xff]  ;;  %v57_v48 = vld [vmem:[%s3971_s0 + $0x100] sm:$0xff] }
  0x11   :  { %v36_v47 = vld [vmem:[%s3971_s0 + $0x58] sm:$0xff]  ;;  %v81_v49 = vld [vmem:[%s3971_s0 + $0x1c0] sm:$0xff]  ;;  %v58_v51 = vld [vmem:[%s3971_s0 + $0x108] sm:$0xff] }
  0x12   :  { %1864 = vmatmul.msk.f32.gmra.mxu0 %vm97_vm0, %v26_v8  ;;  %1885 = vmatmul.msk.f32.gmra.mxu1 %vm97_vm0, %v47_v9  ;;  %v37_v50 = vld [vmem:[%s3971_s0 + $0x60] sm:$0xff]  ;;  %v82_v52 = vld [vmem:[%s3971_s0 + $0x1c8] sm:$0xff]  ;;  %v59_v54 = vld [vmem:[%s3971_s0 + $0x110] sm:$0xff] }
  0x13   :  { %1899 = vmatmul.msk.f32.gmra.mxu2 %vm97_vm0, %v61_v10  ;;  %1909 = vmatmul.msk.f32.gmra.mxu3 %vm97_vm0, %v71_v11  ;;  %v38_v53 = vld [vmem:[%s3971_s0 + $0x68] sm:$0xff]  ;;  %v83_v55 = vld [vmem:[%s3971_s0 + $0x1d0] sm:$0xff]  ;;  %v84_v57 = vld [vmem:[%s3971_s0 + $0x1d8] sm:$0xff] }
  0x14   :  { %v39_v56 = vld [vmem:[%s3971_s0 + $0x70] sm:$0xff]  ;;  %v40_v58 = vld [vmem:[%s3971_s0 + $0x78] sm:$0xff]  ;;  %v85_v59 = vld [vmem:[%s3971_s0 + $0x1e0] sm:$0xff] }
  0x15   :  { %v41_v62 = vld [vmem:[%s3971_s0 + $0x80] sm:$0xff]  ;;  %v86_v63 = vld [vmem:[%s3971_s0 + $0x1e8] sm:$0xff]  ;;  %v87_v7 = vld [vmem:[%s3971_s0 + $0x1f0] sm:$0xff] }
  0x16   :  { %v2550_v0 = vld [vmem:[%s3972_s2] ss:$0 sm:$0xff]  ;;  %v42_v6 = vld [vmem:[%s3971_s0 + $0x88] sm:$0xff] }
  0x1a   :  { %1865 = vmatmul.msk.f32.gmra.mxu0 %vm97_vm0, %v27_v12  ;;  %1886 = vmatmul.msk.f32.gmra.mxu1 %vm97_vm0, %v48_v13 }
  0x1b   :  { %1900 = vmatmul.msk.f32.gmra.mxu2 %vm97_vm0, %v62_v14  ;;  %1910 = vmatmul.msk.f32.gmra.mxu3 %vm97_vm0, %v72_v15 }
  0x22   :  { %1866 = vmatmul.msk.f32.gmra.mxu0 %vm97_vm0, %v28_v16  ;;  %1887 = vmatmul.msk.f32.gmra.mxu1 %vm97_vm0, %v49_v17  ;;  %v43_v16 = vld [vmem:[%s3971_s0 + $0x90] sm:$0xff]  ;;  %v88_v17 = vld [vmem:[%s3971_s0 + $0x1f8] sm:$0xff] }
  0x23   :  { %1901 = vmatmul.msk.f32.gmra.mxu2 %vm97_vm0, %v63_v18  ;;  %1911 = vmatmul.msk.f32.gmra.mxu3 %vm97_vm0, %v73_v19 }
  0x2a   :  { %1867 = vmatmul.msk.f32.gmra.mxu0 %vm97_vm0, %v29_v20  ;;  %1888 = vmatmul.msk.f32.gmra.mxu1 %vm97_vm0, %v50_v21 }
  0x2b   :  { %1902 = vmatmul.msk.f32.gmra.mxu2 %vm97_vm0, %v64_v22  ;;  %1912 = vmatmul.msk.f32.gmra.mxu3 %vm97_vm0, %v74_v23 }
  0x32   :  { %1868 = vmatmul.msk.f32.gmra.mxu0 %vm97_vm0, %v30_v24  ;;  %1889 = vmatmul.msk.f32.gmra.mxu1 %vm97_vm0, %v51_v25 }
  0x33   :  { %1903 = vmatmul.msk.f32.gmra.mxu2 %vm97_vm0, %v65_v26  ;;  %1913 = vmatmul.msk.f32.gmra.mxu3 %vm97_vm0, %v75_v27 }
  0x3a   :  { %1869 = vmatmul.msk.f32.gmra.mxu0 %vm97_vm0, %v31_v28  ;;  %1890 = vmatmul.msk.f32.gmra.mxu1 %vm97_vm0, %v52_v29 }
  0x3b   :  { %1904 = vmatmul.msk.f32.gmra.mxu2 %vm97_vm0, %v66_v30  ;;  %1914 = vmatmul.msk.f32.gmra.mxu3 %vm97_vm0, %v76_v31 }
  0x42   :  { %1870 = vmatmul.msk.f32.gmra.mxu0 %vm97_vm0, %v32_v32  ;;  %1891 = vmatmul.msk.f32.gmra.mxu1 %vm97_vm0, %v53_v33 }
  0x43   :  { %1905 = vmatmul.msk.f32.gmra.mxu2 %vm97_vm0, %v67_v34  ;;  %1915 = vmatmul.msk.f32.gmra.mxu3 %vm97_vm0, %v77_v35 }
  0x4a   :  { %1871 = vmatmul.msk.f32.gmra.mxu0 %vm97_vm0, %v33_v36  ;;  %1892 = vmatmul.msk.f32.gmra.mxu1 %vm97_vm0, %v54_v37  ;;  %v44_v36 = vld [vmem:[%s3971_s0 + $0x98] sm:$0xff] }
  0x4b   :  { %1906 = vmatmul.msk.f32.gmra.mxu2 %vm97_vm0, %v68_v38  ;;  %1916 = vmatmul.msk.f32.gmra.mxu3 %vm97_vm0, %v78_v39 }
  0x52   :  { %1872 = vmatmul.msk.f32.gmra.mxu0 %vm97_vm0, %v34_v40  ;;  %1893 = vmatmul.msk.f32.gmra.mxu1 %vm97_vm0, %v55_v41 }
  0x53   :  { %1907 = vmatmul.msk.f32.gmra.mxu2 %vm97_vm0, %v69_v42  ;;  %1917 = vmatmul.msk.f32.gmra.mxu3 %vm97_vm0, %v79_v43 }
  0x5a   :  { %1873 = vmatmul.msk.f32.gmra.mxu0 %vm97_vm0, %v35_v44  ;;  %1894 = vmatmul.msk.f32.gmra.mxu1 %vm97_vm0, %v56_v45 }
  0x5b   :  { %1918 = vmatmul.msk.f32.gmra.mxu3 %vm97_vm0, %v80_v46 }
  0x62   :  { %1874 = vmatmul.msk.f32.gmra.mxu0 %vm97_vm0, %v36_v47  ;;  %1895 = vmatmul.msk.f32.gmra.mxu1 %vm97_vm0, %v57_v48 }
  0x63   :  { %1919 = vmatmul.msk.f32.gmra.mxu3 %vm97_vm0, %v81_v49 }
  0x6a   :  { %1875 = vmatmul.msk.f32.gmra.mxu0 %vm97_vm0, %v37_v50  ;;  %1896 = vmatmul.msk.f32.gmra.mxu1 %vm97_vm0, %v58_v51 }
  0x6b   :  { %1920 = vmatmul.msk.f32.gmra.mxu3 %vm97_vm0, %v82_v52 }
  0x72   :  { %1876 = vmatmul.msk.f32.gmra.mxu0 %vm97_vm0, %v38_v53  ;;  %1897 = vmatmul.msk.f32.gmra.mxu1 %vm97_vm0, %v59_v54 }
  0x73   :  { %1921 = vmatmul.msk.f32.gmra.mxu3 %vm97_vm0, %v83_v55 }
  0x7a   :  { %1877 = vmatmul.msk.f32.gmra.mxu0 %vm97_vm0, %v39_v56 }
  0x7b   :  { %1922 = vmatmul.msk.f32.gmra.mxu3 %vm97_vm0, %v84_v57 }
  0x82   :  { %1878 = vmatmul.msk.f32.gmra.mxu0 %vm97_vm0, %v40_v58 }
  0x83   :  { %1923 = vmatmul.msk.f32.gmra.mxu3 %vm97_vm0, %v85_v59 }
  0x87   :  { %v307_v60 = vpop.f32.mrf.mxu0  ;;  %v370_v61 = vpop.f32.mrf.mxu1 }
  0x88   :  { %v2565_v9 = vadd.f32 %v2550_v0, %v307_v60  ;;  %v2578_v19 = vadd.f32 %v2550_v0, %v370_v61 }
  0x8a   :  { %1879 = vmatmul.msk.f32.gmra.mxu0 %vm97_vm0, %v41_v62  ;;  %4057 = vst [vmem:[#allocation3_spill] sm:$0xff] %v2565_v9  ;;  %v691_v18 = vand.u32 2147483647, %v2565_v9  ;;  %v712_v26 = vand.u32 2147483647, %v2578_v19 }
  0x8b   :  { %1924 = vmatmul.msk.f32.gmra.mxu3 %vm97_vm0, %v86_v63  ;;  %4058 = vst [vmem:[#allocation4_spill] sm:$0xff] %v2578_v19 }
  0x8c   :  { %v755_v25 = vsub.f32 0.0, %v691_v18  ;;  %v776_v40 = vsub.f32 0.0, %v712_v26 }
  0x8e   :  { %v412_v1 = vpop.f32.mrf.mxu2  ;;  %v442_v2 = vpop.f32.mrf.mxu3  ;;  %v819_v39 = vmul.f32 1.442695, %v755_v25  ;;  %v861_v50 = vmul.f32 1.442695, %v776_v40 }
  0x8f   :  { %v2553_v3 = vadd.f32 %v2550_v0, %v442_v2  ;;  %v310_v4 = vpop.f32.mrf.mxu0  ;;  %v373_v5 = vpop.f32.mrf.mxu1  ;;  %v2582_v21 = vadd.f32 %v2550_v0, %v412_v1  ;;  %v45_v1 = vld [vmem:[%s3971_s0 + $0xa0] sm:$0xff] }
  0x90   :  { %v2587_v24 = vadd.f32 %v2550_v0, %v310_v4  ;;  %v2592_v29 = vadd.f32 %v2550_v0, %v373_v5 }
  0x91   :  { %v736_v8 = vand.u32 2147483647, %v2553_v3  ;;  %4059 = vst [vmem:[#allocation5_spill] sm:$0xff] %v2582_v21  ;;  %v726_v28 = vand.u32 2147483647, %v2582_v21  ;;  %vm608_vm6 = vcmp.ne.f32.partialorder %v2553_v3, %v2553_v3 }
  0x92   :  { %1880 = vmatmul.msk.f32.gmra.mxu0 %vm97_vm0, %v42_v6  ;;  %4060 = vst [vmem:[#allocation6_spill] sm:$0xff] %v2587_v24  ;;  %v692_v37 = vand.u32 2147483647, %v2587_v24  ;;  %v713_v43 = vand.u32 2147483647, %v2592_v29 }
  0x93   :  { %1925 = vmatmul.msk.f32.gmra.mxu3 %vm97_vm0, %v87_v7  ;;  %v800_v12 = vsub.f32 0.0, %v736_v8  ;;  %4061 = vst [vmem:[#allocation7_spill] sm:$0xff] %v2592_v29  ;;  %v790_v42 = vsub.f32 0.0, %v726_v28 }
  0x94   :  { %v756_v47 = vsub.f32 0.0, %v692_v37  ;;  %v777_v54 = vsub.f32 0.0, %v713_v43 }
  0x95   :  { %v909_v22 = vmul.f32 1.442695, %v800_v12  ;;  %v889_v53 = vmul.f32 1.442695, %v790_v42 }
  0x96   :  { %v415_v10 = vpop.f32.mrf.mxu2  ;;  %v445_v11 = vpop.f32.mrf.mxu3  ;;  %v821_v4 = vmul.f32 1.442695, %v756_v47  ;;  %v863_v7 = vmul.f32 1.442695, %v777_v54 }
  0x97   :  { %v2568_v13 = vadd.f32 %v2550_v0, %v445_v11  ;;  %v313_v14 = vpop.f32.mrf.mxu0  ;;  %v376_v15 = vpop.f32.mrf.mxu1  ;;  %2014 = vpow2.f32 %v909_v22  ;;  %v2595_v32 = vadd.f32 %v2550_v0, %v415_v10  ;;  %v544_v22 = vmax.f32 %v2553_v3, 0.0 }
  0x98   :  { %v2605_v38 = vadd.f32 %v2550_v0, %v313_v14  ;;  %v2610_v44 = vadd.f32 %v2550_v0, %v376_v15 }
  0x99   :  { %v737_v20 = vand.u32 2147483647, %v2568_v13  ;;  %4062 = vst [vmem:[#allocation8_spill] sm:$0xff] %v2595_v32  ;;  %v727_v45 = vand.u32 2147483647, %v2595_v32  ;;  %vm609_vm3 = vcmp.ne.f32.partialorder %v2568_v13, %v2568_v13 }
  0x9a   :  { %1881 = vmatmul.msk.f32.gmra.mxu0 %vm97_vm0, %v43_v16  ;;  %4063 = vst [vmem:[#allocation9_spill] sm:$0xff] %v2605_v38  ;;  %v693_v48 = vand.u32 2147483647, %v2605_v38  ;;  %v714_v55 = vand.u32 2147483647, %v2610_v44 }
  0x9b   :  { %v801_v23 = vsub.f32 0.0, %v737_v20  ;;  %1926 = vmatmul.msk.f32.gmra.mxu3 %vm97_vm0, %v88_v17  ;;  %4064 = vst [vmem:[#allocation10_spill] sm:$0xff] %v2610_v44  ;;  %v791_v59 = vsub.f32 0.0, %v727_v45  ;;  %v545_v20 = vmax.f32 %v2568_v13, 0.0 }
  0x9c   :  { %v757_v5 = vsub.f32 0.0, %v693_v48  ;;  %v778_v8 = vsub.f32 0.0, %v714_v55 }
  0x9d   :  { %v911_v27 = vmul.f32 1.442695, %v801_v23  ;;  %v2615_v49 = vpop.eup %2014  ;;  %v891_v12 = vmul.f32 1.442695, %v791_v59 }
  0x9e   :  { %v418_v30 = vpop.f32.mrf.mxu2  ;;  %v448_v31 = vpop.f32.mrf.mxu3  ;;  %v1352_v6 = vadd.f32 1.0, %v2615_v49  ;;  %v823_v16 = vmul.f32 1.442695, %v757_v5  ;;  %v1355_v17 = vmul.f32 -0.5, %v2615_v49  ;;  %v865_v25 = vmul.f32 1.442695, %v778_v8 }
  0x9f   :  { %v2598_v33 = vadd.f32 %v2550_v0, %v448_v31  ;;  %v316_v34 = vpop.f32.mrf.mxu0  ;;  %v379_v35 = vpop.f32.mrf.mxu1  ;;  %2016 = vpow2.f32 %v911_v27  ;;  %v2621_v56 = vadd.f32 %v2550_v0, %v418_v30 }
  0xa0   :  { %2018 = vpow2.f32 %v819_v39  ;;  %v2624_v60 = vadd.f32 %v2550_v0, %v316_v34  ;;  %v2627_v61 = vadd.f32 %v2550_v0, %v379_v35  ;;  %v1356_v43 = vadd.f32 1.0, %v1355_v17 }
  0xa1   :  { %v738_v41 = vand.u32 2147483647, %v2598_v33  ;;  %4065 = vst [vmem:[#allocation11_spill] sm:$0xff] %v2621_v56  ;;  %v728_v10 = vand.u32 2147483647, %v2621_v56  ;;  %v546_v48 = vmax.f32 %v2598_v33, 0.0  ;;  %vm610_vm2 = vcmp.ne.f32.partialorder %v2598_v33, %v2598_v33 }
  0xa2   :  { %1882 = vmatmul.msk.f32.gmra.mxu0 %vm97_vm0, %v44_v36  ;;  %4066 = vst [vmem:[#allocation12_spill] sm:$0xff] %v2624_v60  ;;  %v694_v14 = vand.u32 2147483647, %v2624_v60  ;;  %v715_v15 = vand.u32 2147483647, %v2627_v61  ;;  %v1357_v5 = vmul.f32 %v2615_v49, %v1356_v43 }
  0xa3   :  { %v802_v46 = vsub.f32 0.0, %v738_v41  ;;  %4067 = vst [vmem:[#allocation13_spill] sm:$0xff] %v2627_v61  ;;  %v792_v26 = vsub.f32 0.0, %v728_v10 }
  0xa4   :  { %v758_v34 = vsub.f32 0.0, %v694_v14  ;;  %v779_v35 = vsub.f32 0.0, %v715_v15 }
  0xa5   :  { %v913_v51 = vmul.f32 1.442695, %v802_v46  ;;  %v2617_v52 = vpop.eup %2016 }
  0xa6   :  { %v421_v57 = vpop.f32.mrf.mxu2  ;;  %v451_v58 = vpop.f32.mrf.mxu3  ;;  %v1361_v2 = vadd.f32 1.0, %v2617_v52  ;;  %v1364_v30 = vmul.f32 -0.5, %v2617_v52  ;;  %v867_v59 = vmul.f32 1.442695, %v779_v35 }
  0xa7   :  { %v319_v62 = vpop.f32.mrf.mxu0  ;;  %v382_v63 = vpop.f32.mrf.mxu1  ;;  %2020 = vpow2.f32 %v913_v51  ;;  %v2642_v18 = vadd.f32 %v2550_v0, %v421_v57  ;;  %v2655_v41 = vadd.f32 %v2550_v0, %v451_v58  ;;  %v825_v58 = vmul.f32 1.442695, %v758_v34 }
  0xa8   :  { %2022 = vpow2.f32 %v861_v50  ;;  %v2636_v11 = vpop.eup %2018  ;;  %v2658_v42 = vadd.f32 %v2550_v0, %v319_v62  ;;  %v2662_v47 = vadd.f32 %v2550_v0, %v382_v63  ;;  %v1358_v50 = vand.u32 2147483647, %v2615_v49 }
  0xa9   :  { %2024 = vpow2.f32 %v889_v53  ;;  %4068 = vst [vmem:[#allocation14_spill] sm:$0xff] %v2636_v11  ;;  %v729_v46 = vand.u32 2147483647, %v2642_v18  ;;  %v893_v53 = vmul.f32 1.442695, %v792_v26  ;;  %v1365_v55 = vadd.f32 1.0, %v1364_v30 }
  0xaa   :  { %1883 = vmatmul.msk.f32.gmra.mxu0 %vm97_vm0, %v45_v1  ;;  %2026 = vlog2.f32 %v1361_v2  ;;  %4071 = vst [vmem:[#allocation17_spill] sm:$0xff] %v2655_v41  ;;  %v1367_v62 = vand.u32 2147483647, %v2617_v52  ;;  %v739_v63 = vand.u32 2147483647, %v2655_v41 }
  0xab   :  { %2028 = vpow2.f32 %v821_v4  ;;  %4072 = vst [vmem:[#allocation18_spill] sm:$0xff] %v2658_v42  ;;  %v695_v2 = vand.u32 2147483647, %v2658_v42  ;;  %v716_v8 = vand.u32 2147483647, %v2662_v47 }
  0xac   :  { %2030 = vlog2.f32 %v1352_v6  ;;  %vm2681_vm1 = vcmp.lt.f32.partialorder %v1358_v50, 0.0004427343  ;;  %vm2699_vm4 = vcmp.lt.f32.partialorder %v1367_v62, 0.0004427343  ;;  %v803_v43 = vsub.f32 0.0, %v739_v63 }
  0xad   :  { %v2646_v23 = vpop.eup %2020  ;;  %2032 = vpow2.f32 %v863_v7  ;;  %v793_v7 = vsub.f32 0.0, %v729_v46  ;;  %v780_v50 = vsub.f32 0.0, %v716_v8 }
  0xae   :  { %v424_v27 = vpop.f32.mrf.mxu2  ;;  %v454_v28 = vpop.f32.mrf.mxu3  ;;  %2034 = vpow2.f32 %v891_v12  ;;  %v1370_v39 = vadd.f32 1.0, %v2646_v23  ;;  %v1373_v54 = vmul.f32 -0.5, %v2646_v23 }
  0xaf   :  { %v2649_v31 = vpop.eup %2022  ;;  %v322_v36 = vpop.f32.mrf.mxu0  ;;  %2036 = vpow2.f32 %v823_v16  ;;  %v2679_v10 = vadd.f32 %v2550_v0, %v424_v27  ;;  %v2688_v15 = vadd.f32 %v2550_v0, %v454_v28  ;;  %v1376_v28 = vand.u32 2147483647, %v2646_v23 }
  0xb0   :  { %4069 = vst [vmem:[#allocation15_spill] sm:$0xff] %v2649_v31  ;;  %v385_v37 = vpop.f32.mrf.mxu1  ;;  %v2652_v40 = vpop.eup %2024  ;;  %2038 = vpow2.f32 %v865_v25  ;;  %v1374_v49 = vadd.f32 1.0, %v1373_v54  ;;  %v1366_v25 = vmul.f32 %v2617_v52, %v1365_v55  ;;  %v2696_v27 = vadd.f32 %v2550_v0, %v322_v36 }
  0xb1   :  { %4070 = vst [vmem:[#allocation16_spill] sm:$0xff] %v2652_v40  ;;  %v2027_v45 = vpop.eup %2026  ;;  %2040 = vlog2.f32 %v1370_v39  ;;  %v895_v36 = vmul.f32 1.442695, %v793_v7  ;;  %v740_v54 = vand.u32 2147483647, %v2688_v15  ;;  %v2714_v63 = vadd.f32 %v2550_v0, %v385_v37 }
  0xb2   :  { %v2666_v51 = vpop.eup %2028  ;;  %v1363_v4 = vmul.f32 0.6931472, %v2027_v45  ;;  %4079 = vst [vmem:[#allocation23_spill] sm:$0xff] %v2688_v15  ;;  %2042 = vpow2.f32 %v893_v53  ;;  %v759_v45 = vsub.f32 0.0, %v695_v2  ;;  %v730_v53 = vand.u32 2147483647, %v2679_v10 }
  0xb3   :  { %4073 = vst [vmem:[#allocation19_spill] sm:$0xff] %v2666_v51  ;;  %v2031_v57 = vpop.eup %2030  ;;  %2044 = vpow2.f32 %v825_v58  ;;  %v696_v58 = vand.u32 2147483647, %v2696_v27  ;;  %vm1377_vm5 = vcmp.lt.f32.partialorder %v1376_v28, 0.0004427343 }
  0xb4   :  { %v2670_v1 = vpop.eup %2032  ;;  %v1354_v26 = vmul.f32 0.6931472, %v2031_v57  ;;  %4080 = vst [vmem:[#allocation24_spill] sm:$0xff] %v2696_v27  ;;  %v1369_v52 = vsel %vm2699_vm4, %v1366_v25, %v1363_v4  ;;  %2046 = vpow2.f32 %v867_v59  ;;  %v1375_v57 = vmul.f32 %v2646_v23, %v1374_v49 }
  0xb5   :  { %4074 = vst [vmem:[#allocation20_spill] sm:$0xff] %v2670_v1  ;;  %v2675_v6 = vpop.eup %2034  ;;  %v1569_v59 = vadd.f32 %v1369_v52, %v545_v20  ;;  %v915_v2 = vmul.f32 1.442695, %v803_v43  ;;  %v827_v4 = vmul.f32 1.442695, %v759_v45  ;;  %v794_v23 = vsub.f32 0.0, %v730_v53 }
  0xb6   :  { %4075 = vst [vmem:[#allocation21_spill] sm:$0xff] %v2675_v6  ;;  %v2685_v14 = vpop.eup %2036  ;;  %v427_v16 = vpop.f32.mrf.mxu2  ;;  %v1360_v62 = vsel %vm2681_vm1, %v1357_v5, %v1354_v26  ;;  %2048 = vpow2.f32 %v895_v36  ;;  %v869_v20 = vmul.f32 1.442695, %v780_v50  ;;  %v804_v26 = vsub.f32 0.0, %v740_v54 }
  0xb7   :  { %4078 = vst [vmem:[#allocation22_spill] sm:$0xff] %v2685_v14  ;;  %v457_v17 = vpop.f32.mrf.mxu3  ;;  %v325_v30 = vpop.f32.mrf.mxu0  ;;  %v2719_v7 = vadd.f32 %v2550_v0, %v427_v16  ;;  %v1568_v37 = vadd.f32 %v1360_v62, %v544_v22  ;;  %v760_v45 = vsub.f32 0.0, %v696_v58  ;;  %2050 = vpow2.f32 %v915_v2 }
  0xb8   :  { %v388_v34 = vpop.f32.mrf.mxu1  ;;  %v2703_v39 = vpop.eup %2038  ;;  %v2724_v5 = vadd.f32 %v2550_v0, %v457_v17  ;;  %v2731_v28 = vadd.f32 %v2550_v0, %v325_v30  ;;  %v717_v17 = vand.u32 2147483647, %v2714_v63  ;;  %v1633_v30 = vsel %vm609_vm3, %v2568_v13, %v1569_v59 }
  0xb9   :  { %4083 = vst [vmem:[#allocation25_spill] sm:$0xff] %v2703_v39  ;;  %v2041_v46 = vpop.eup %2040  ;;  %v897_v50 = vmul.f32 1.442695, %v794_v23  ;;  %v2749_v54 = vadd.f32 %v2550_v0, %v388_v34  ;;  %2052 = vpow2.f32 %v827_v4  ;;  %v1973_v13 = vadd.f32 -0.6931472, %v1633_v30 }
  0xba   :  { %v1372_v55 = vmul.f32 0.6931472, %v2041_v46  ;;  %v2721_v25 = vpop.eup %2042  ;;  %4084 = vst [vmem:[#allocation26_spill] sm:$0xff] %v2724_v5  ;;  %v731_v46 = vand.u32 2147483647, %v2719_v7  ;;  %2054 = vpow2.f32 %v869_v20  ;;  %v781_v58 = vsub.f32 0.0, %v717_v17 }
  0xbb   :  { %v2728_v49 = vpop.eup %2044  ;;  %4086 = vst [vmem:[#allocation28_spill] sm:$0xff] %v2731_v28  ;;  %v741_v53 = vand.u32 2147483647, %v2724_v5  ;;  %v829_v62 = vmul.f32 1.442695, %v760_v45  ;;  %2056 = vpow2.f32 %v897_v50 }
  0xbc   :  { %v1378_v8 = vsel %vm1377_vm5, %v1375_v57, %v1372_v55  ;;  %4085 = vst [vmem:[#allocation27_spill] sm:$0xff] %v2728_v49  ;;  %v2733_v43 = vpop.eup %2046  ;;  %v917_v55 = vmul.f32 1.442695, %v804_v26  ;;  %v697_v57 = vand.u32 2147483647, %v2731_v28 }
  0xbd   :  { %v1570_v12 = vadd.f32 %v1378_v8, %v546_v48  ;;  %v2756_v2 = vpop.eup %2048  ;;  %v795_v8 = vsub.f32 0.0, %v731_v46  ;;  %v805_v23 = vsub.f32 0.0, %v741_v53 }
  0xbe   :  { %v430_v16 = vpop.f32.mrf.mxu2  ;;  %2058 = vpow2.f32 %v917_v55  ;;  %v761_v20 = vsub.f32 0.0, %v697_v57 }
  0xbf   :  { %v460_v35 = vpop.f32.mrf.mxu3  ;;  %v328_v52 = vpop.f32.mrf.mxu0  ;;  %v1634_v22 = vsel %vm610_vm2, %v2598_v33, %v1570_v12  ;;  %v1632_v33 = vsel %vm608_vm6, %v2553_v3, %v1568_v37  ;;  %v2754_v59 = vadd.f32 %v2550_v0, %v430_v16  ;;  %v718_v12 = vand.u32 2147483647, %v2749_v54 }
  0xc0   :  { %v391_v48 = vpop.f32.mrf.mxu1  ;;  %v1974_v36 = vadd.f32 -0.6931472, %v1634_v22  ;;  %v2759_v34 = vadd.f32 %v2550_v0, %v460_v35  ;;  %v2762_v3 = vadd.f32 %v2550_v0, %v328_v52  ;;  %v1972_v4 = vadd.f32 -0.6931472, %v1632_v33  ;;  %v2765_v37 = vpop.eup %2050 }
  0xc1   :  { %4089 = vst [vmem:[#allocation31_spill] sm:$0xff] %v2765_v37  ;;  %v2768_v26 = vadd.f32 %v2550_v0, %v391_v48  ;;  %2060 = vpow2.f32 %v829_v62  ;;  %v871_v35 = vmul.f32 1.442695, %v781_v58  ;;  %v732_v17 = vand.u32 2147483647, %v2754_v59  ;;  %v2774_v46 = vpop.eup %2052 }
  0xc2   :  { %1775 = vmatpush.msrb.mxu3 %v1974_v36  ;;  %4087 = vst [vmem:[#allocation29_spill] sm:$0xff] %v2759_v34  ;;  %v899_v36 = vmul.f32 1.442695, %v795_v8  ;;  %v742_v50 = vand.u32 2147483647, %v2759_v34  ;;  %v2781_v33 = vpop.eup %2054  ;;  %v782_v57 = vsub.f32 0.0, %v718_v12  ;;  %vm604_vm4 = vcmp.ne.f32.partialorder %v2754_v59, %v2754_v59 }
  0xc3   :  { %4088 = vst [vmem:[#allocation30_spill] sm:$0xff] %v2762_v3  ;;  %v698_v48 = vand.u32 2147483647, %v2762_v3  ;;  %v919_v55 = vmul.f32 1.442695, %v805_v23  ;;  %v2792_v41 = vpop.eup %2056  ;;  %2062 = vpow2.f32 %v871_v35  ;;  %vm591_vm5 = vcmp.ne.f32.partialorder %v2768_v26, %v2768_v26 }
  0xc4   :  { %1776 = vmatpush.msrb.mxu3 %v1973_v13  ;;  %4090 = vst [vmem:[#allocation32_spill] sm:$0xff] %v2774_v46  ;;  %v831_v58 = vmul.f32 1.442695, %v761_v20  ;;  %v2794_v23 = vpop.eup %2058  ;;  %2064 = vpow2.f32 %v899_v36  ;;  %v806_v12 = vsub.f32 0.0, %v742_v50  ;;  %v873_v24 = vmul.f32 1.442695, %v782_v57 }
  0xc5   :  { %4093 = vst [vmem:[#allocation35_spill] sm:$0xff] %v2794_v23  ;;  %v762_v9 = vsub.f32 0.0, %v698_v48  ;;  %2066 = vpow2.f32 %v919_v55 }
  0xc6   :  { %v433_v16 = vpop.f32.mrf.mxu2  ;;  %1777 = vmatpush.msrb.mxu3 %v1972_v4  ;;  %v719_v4 = vand.u32 2147483647, %v2768_v26  ;;  %2068 = vpow2.f32 %v831_v58 }
  0xc7   :  { %v463_v45 = vpop.f32.mrf.mxu3  ;;  %v2772_v52 = vadd.f32 %v2550_v0, %v433_v16  ;;  %v331_v22 = vpop.f32.mrf.mxu0 }
  0xc8   :  { %v394_v30 = vpop.f32.mrf.mxu1  ;;  %v2785_v62 = vadd.f32 %v2550_v0, %v463_v45  ;;  %v2789_v8 = vadd.f32 %v2550_v0, %v331_v22  ;;  %v2796_v11 = vpop.eup %2060  ;;  %v783_v38 = vsub.f32 0.0, %v719_v4 }
  0xc9   :  { %v2779_v53 = vadd.f32 %v2550_v0, %v394_v30  ;;  %v733_v13 = vand.u32 2147483647, %v2772_v52  ;;  %v796_v30 = vsub.f32 0.0, %v732_v17  ;;  %4094 = vst [vmem:[#allocation36_spill] sm:$0xff] %v2796_v11  ;;  %v2812_v4 = vpop.eup %2062  ;;  %v541_v39 = vmax.f32 %v2772_v52, 0.0 }
  0xca   :  { %4091 = vst [vmem:[#allocation33_spill] sm:$0xff] %v2785_v62  ;;  %v743_v22 = vand.u32 2147483647, %v2785_v62  ;;  %v699_v51 = vand.u32 2147483647, %v2789_v8  ;;  %vm605_vm15 = vcmp.ne.f32.partialorder %v2772_v52, %v2772_v52 }
  0xcb   :  { %4092 = vst [vmem:[#allocation34_spill] sm:$0xff] %v2789_v8  ;;  %v720_v16 = vand.u32 2147483647, %v2779_v53  ;;  %v797_v37 = vsub.f32 0.0, %v733_v13  ;;  %v901_v13 = vmul.f32 1.442695, %v796_v30  ;;  %vm592_vm3 = vcmp.ne.f32.partialorder %v2779_v53, %v2779_v53 }
  0xcc   :  { %v807_v30 = vsub.f32 0.0, %v743_v22  ;;  %v763_v23 = vsub.f32 0.0, %v699_v51 }
  0xcd   :  { %v784_v45 = vsub.f32 0.0, %v720_v16  ;;  %v903_v20 = vmul.f32 1.442695, %v797_v37  ;;  %v921_v37 = vmul.f32 1.442695, %v806_v12 }
  0xce   :  { %v436_v35 = vpop.f32.mrf.mxu2  ;;  %v833_v16 = vmul.f32 1.442695, %v762_v9  ;;  %v923_v49 = vmul.f32 1.442695, %v807_v30 }
  0xcf   :  { %v466_v17 = vpop.f32.mrf.mxu3  ;;  %v877_v60 = vmul.f32 1.442695, %v784_v45  ;;  %v2801_v36 = vadd.f32 %v2550_v0, %v436_v35  ;;  %v334_v48 = vpop.f32.mrf.mxu0  ;;  %2070 = vpow2.f32 %v903_v20  ;;  %v875_v20 = vmul.f32 1.442695, %v783_v38 }
  0xd0   :  { %v2804_v50 = vadd.f32 %v2550_v0, %v466_v17  ;;  %v397_v55 = vpop.f32.mrf.mxu1  ;;  %v2807_v58 = vadd.f32 %v2550_v0, %v334_v48  ;;  %v2816_v17 = vpop.eup %2064  ;;  %2072 = vpow2.f32 %v873_v24  ;;  %v835_v24 = vmul.f32 1.442695, %v763_v23 }
  0xd1   :  { %v2810_v57 = vadd.f32 %v2550_v0, %v397_v55  ;;  %v734_v45 = vand.u32 2147483647, %v2801_v36  ;;  %v2820_v48 = vpop.eup %2066  ;;  %2074 = vpow2.f32 %v877_v60  ;;  %vm606_vm7 = vcmp.ne.f32.partialorder %v2801_v36, %v2801_v36 }
  0xd2   :  { %4095 = vst [vmem:[#allocation37_spill] sm:$0xff] %v2804_v50  ;;  %v744_v35 = vand.u32 2147483647, %v2804_v50  ;;  %v700_v9 = vand.u32 2147483647, %v2807_v58  ;;  %v2822_v42 = vpop.eup %2068  ;;  %2076 = vpow2.f32 %v901_v13 }
  0xd3   :  { %4096 = vst [vmem:[#allocation38_spill] sm:$0xff] %v2807_v58  ;;  %v721_v12 = vand.u32 2147483647, %v2810_v57  ;;  %v798_v55 = vsub.f32 0.0, %v734_v45  ;;  %2078 = vpow2.f32 %v921_v37  ;;  %vm593_vm12 = vcmp.ne.f32.partialorder %v2810_v57, %v2810_v57 }
  0xd4   :  { %4097 = vst [vmem:[#allocation39_spill] sm:$0xff] %v2820_v48  ;;  %v808_v14 = vsub.f32 0.0, %v744_v35  ;;  %v764_v22 = vsub.f32 0.0, %v700_v9  ;;  %2080 = vpow2.f32 %v833_v16 }
  0xd5   :  { %4098 = vst [vmem:[#allocation40_spill] sm:$0xff] %v2822_v42  ;;  %v905_v27 = vmul.f32 1.442695, %v798_v55  ;;  %v785_v46 = vsub.f32 0.0, %v721_v12  ;;  %v2824_v11 = vpop.eup %2070 }
  0xd6   :  { %v439_v51 = vpop.f32.mrf.mxu2  ;;  %v925_v48 = vmul.f32 1.442695, %v808_v14  ;;  %v2832_v37 = vpop.eup %2072  ;;  %v837_v30 = vmul.f32 1.442695, %v764_v22 }
  0xd7   :  { %v469_v28 = vpop.f32.mrf.mxu3  ;;  %2082 = vpow2.f32 %v905_v27  ;;  %v2827_v60 = vadd.f32 %v2550_v0, %v439_v51  ;;  %v337_v38 = vpop.f32.mrf.mxu0  ;;  %v879_v14 = vmul.f32 1.442695, %v785_v46 }
  0xd8   :  { %v2830_v45 = vadd.f32 %v2550_v0, %v469_v28  ;;  %v400_v13 = vpop.f32.mrf.mxu1  ;;  %2084 = vpow2.f32 %v875_v20  ;;  %v2835_v23 = vadd.f32 %v2550_v0, %v337_v38  ;;  %v2840_v27 = vpop.eup %2074  ;;  %v1325_v20 = vadd.f32 1.0, %v2824_v11 }
  0xd9   :  { %v2838_v16 = vadd.f32 %v2550_v0, %v400_v13  ;;  %2086 = vpow2.f32 %v923_v49  ;;  %v735_v35 = vand.u32 2147483647, %v2827_v60  ;;  %v2844_v9 = vpop.eup %2076  ;;  %v1208_v13 = vadd.f32 1.0, %v2840_v27 }
  0xda   :  { %4099 = vst [vmem:[#allocation41_spill] sm:$0xff] %v2830_v45  ;;  %v745_v28 = vand.u32 2147483647, %v2830_v45  ;;  %2088 = vpow2.f32 %v835_v24  ;;  %v701_v12 = vand.u32 2147483647, %v2835_v23  ;;  %v2849_v22 = vpop.eup %2078  ;;  %v1316_v8 = vadd.f32 1.0, %v2844_v9 }
  0xdb   :  { %4100 = vst [vmem:[#allocation42_spill] sm:$0xff] %v2835_v23  ;;  %v722_v55 = vand.u32 2147483647, %v2838_v16  ;;  %2090 = vpow2.f32 %v925_v48  ;;  %v799_v51 = vsub.f32 0.0, %v735_v35  ;;  %v2851_v38 = vpop.eup %2080  ;;  %vm607_vm9 = vcmp.ne.f32.partialorder %v2827_v60, %v2827_v60 }
  0xdc   :  { %4101 = vst [vmem:[#allocation43_spill] sm:$0xff] %v2849_v22  ;;  %2092 = vpow2.f32 %v837_v30  ;;  %v809_v49 = vsub.f32 0.0, %v745_v28  ;;  %v765_v42 = vsub.f32 0.0, %v701_v12  ;;  %vm594_vm10 = vcmp.ne.f32.partialorder %v2838_v16, %v2838_v16 }
  0xdd   :  { %4102 = vst [vmem:[#allocation44_spill] sm:$0xff] %v2851_v38  ;;  %v786_v46 = vsub.f32 0.0, %v722_v55  ;;  %v2083_v3 = vpop.eup %2082  ;;  %2094 = vpow2.f32 %v879_v14  ;;  %v907_v24 = vmul.f32 1.442695, %v799_v51 }
  0xde   :  { %v2855_v58 = vpop.eup %2084  ;;  %2096 = vlog2.f32 %v1325_v20  ;;  %v1334_v28 = vadd.f32 1.0, %v2083_v3  ;;  %v927_v14 = vmul.f32 1.442695, %v809_v49  ;;  %v1337_v51 = vmul.f32 -0.5, %v2083_v3 }
  0xdf   :  { %v881_v23 = vmul.f32 1.442695, %v786_v46  ;;  %v472_v19 = vpop.f32.mrf.mxu3  ;;  %v2857_v48 = vpop.eup %2086  ;;  %2098 = vpow2.f32 %v907_v24  ;;  %v839_v20 = vmul.f32 1.442695, %v765_v42  ;;  %v1340_v46 = vand.u32 2147483647, %v2083_v3 }
  0xe0   :  { %4103 = vst [vmem:[#allocation45_spill] sm:$0xff] %v2857_v48  ;;  %v2860_v30 = vadd.f32 %v2550_v0, %v472_v19  ;;  %v340_v35 = vpop.f32.mrf.mxu0  ;;  %v2862_v55 = vpop.eup %2088  ;;  %2100 = vlog2.f32 %v1208_v13  ;;  %v2881_v19 = vadd.f32 1.0, %v2855_v58  ;;  %v1328_v13 = vmul.f32 -0.5, %v2824_v11 }
  0xe1   :  { %4105 = vst [vmem:[#allocation47_spill] sm:$0xff] %v2862_v55  ;;  %v2864_v12 = vpop.eup %2090  ;;  %2102 = vlog2.f32 %v1316_v8  ;;  %v2878_v22 = vadd.f32 %v2550_v0, %v340_v35  ;;  %v1338_v8 = vadd.f32 1.0, %v1337_v51  ;;  %vm2898_vm8 = vcmp.lt.f32.partialorder %v1340_v46, 0.0004427343 }
  0xe2   :  { %4104 = vst [vmem:[#allocation46_spill] sm:$0xff] %v2860_v30  ;;  %v2868_v48 = vpop.eup %2092  ;;  %2104 = vpow2.f32 %v881_v23  ;;  %v1329_v6 = vadd.f32 1.0, %v1328_v13 }
  0xe3   :  { %4106 = vst [vmem:[#allocation48_spill] sm:$0xff] %v2864_v12  ;;  %v2873_v49 = vpop.eup %2094  ;;  %v746_v12 = vand.u32 2147483647, %v2860_v30  ;;  %2106 = vlog2.f32 %v1334_v28  ;;  %v1339_v45 = vmul.f32 %v2083_v3, %v1338_v8 }
  0xe4   :  { %4107 = vst [vmem:[#allocation49_spill] sm:$0xff] %v2868_v48  ;;  %v2097_v42 = vpop.eup %2096  ;;  %2108 = vpow2.f32 %v927_v14  ;;  %v542_v14 = vmax.f32 %v2801_v36, 0.0  ;;  %v1220_v51 = vmul.f32 -0.5, %v2873_v49  ;;  %v1217_v29 = vadd.f32 1.0, %v2873_v49 }
  0xe5   :  { %4108 = vst [vmem:[#allocation50_spill] sm:$0xff] %v2878_v22  ;;  %v2099_v24 = vpop.eup %2098  ;;  %2110 = vpow2.f32 %v839_v20  ;;  %v810_v62 = vsub.f32 0.0, %v746_v12  ;;  %v702_v20 = vand.u32 2147483647, %v2878_v22  ;;  %v1327_v61 = vmul.f32 0.6931472, %v2097_v42 }
  0xe6   :  { %v2886_v15 = vpop.eup %2100  ;;  %v1343_v5 = vadd.f32 1.0, %v2099_v24  ;;  %v1346_v28 = vmul.f32 -0.5, %v2099_v24  ;;  %v1221_v8 = vadd.f32 1.0, %v1220_v51 }
  0xe7   :  { %v475_v35 = vpop.f32.mrf.mxu3  ;;  %v2890_v34 = vpop.eup %2102  ;;  %v2914_v44 = vmul.f32 1.442695, %v810_v62  ;;  %v766_v40 = vsub.f32 0.0, %v702_v20 }
  0xe8   :  { %v2894_v23 = vadd.f32 %v2550_v0, %v475_v35  ;;  %v343_v38 = vpop.f32.mrf.mxu0  ;;  %v2105_v50 = vpop.eup %2104  ;;  %2112 = vlog2.f32 %v1343_v5  ;;  %v1349_v35 = vand.u32 2147483647, %v2099_v24  ;;  %v1347_v3 = vadd.f32 1.0, %v1346_v28 }
  0xe9   :  { %v2107_v12 = vpop.eup %2106  ;;  %v2905_v22 = vadd.f32 %v2550_v0, %v343_v38  ;;  %v1226_v31 = vadd.f32 1.0, %v2105_v50  ;;  %v1229_v46 = vmul.f32 -0.5, %v2105_v50 }
  0xea   :  { %v2907_v21 = vpop.eup %2108  ;;  %v747_v1 = vand.u32 2147483647, %v2894_v23  ;;  %v1336_v38 = vmul.f32 0.6931472, %v2107_v12  ;;  %vm2920_vm11 = vcmp.lt.f32.partialorder %v1349_v35, 0.0004427343  ;;  %v1348_v12 = vmul.f32 %v2099_v24, %v1347_v3 }
  0xeb   :  { %4111 = vst [vmem:[#allocation51_spill] sm:$0xff] %v2905_v22  ;;  %v2912_v48 = vpop.eup %2110  ;;  %2114 = vlog2.f32 %v1226_v31  ;;  %v1230_v5 = vadd.f32 1.0, %v1229_v46  ;;  %v703_v32 = vand.u32 2147483647, %v2905_v22  ;;  %v1223_v31 = vand.u32 2147483647, %v2873_v49 }
  0xec   :  { %4112 = vst [vmem:[#allocation52_spill] sm:$0xff] %v2907_v21  ;;  %v1232_v21 = vand.u32 2147483647, %v2105_v50  ;;  %2116 = vlog2.f32 %v1217_v29  ;;  %v1342_v62 = vsel %vm2898_vm8, %v1339_v45, %v1336_v38  ;;  %v811_v51 = vsub.f32 0.0, %v747_v1 }
  0xed   :  { %4113 = vst [vmem:[#allocation53_spill] sm:$0xff] %v2912_v48  ;;  %v1566_v29 = vadd.f32 %v1342_v62, %v542_v14  ;;  %v1222_v46 = vmul.f32 %v2873_v49, %v1221_v8  ;;  %v1331_v45 = vand.u32 2147483647, %v2824_v11  ;;  %v1231_v56 = vmul.f32 %v2105_v50, %v1230_v5 }
  0xee   :  { %v2113_v48 = vpop.eup %2112  ;;  %vm2937_vm13 = vcmp.lt.f32.partialorder %v1232_v21, 0.0004427343  ;;  %vm2945_vm14 = vcmp.lt.f32.partialorder %v1223_v31, 0.0004427343  ;;  %v841_v62 = vmul.f32 1.442695, %v766_v40  ;;  %2118 = vpow2.f32 %v2914_v44 }
  0xef   :  { %v478_v20 = vpop.f32.mrf.mxu3  ;;  %v1345_v38 = vmul.f32 0.6931472, %v2113_v48  ;;  %v1630_v49 = vsel %vm606_vm7, %v2801_v36, %v1566_v29  ;;  %vm1332_vm0 = vcmp.lt.f32.partialorder %v1331_v45, 0.0004427343  ;;  %v4120_v36 = vmax.f32 %v2827_v60, 0.0 }
  0xf0   :  { %v2931_v35 = vadd.f32 %v2550_v0, %v478_v20  ;;  %v346_v22 = vpop.f32.mrf.mxu0  ;;  %v767_v31 = vsub.f32 0.0, %v703_v32  ;;  %v4121_v20 = vmax.f32 %v2838_v16, 0.0  ;;  %v1970_v29 = vadd.f32 -0.6931472, %v1630_v49 }
  0xf1   :  { %v2935_v55 = vadd.f32 %v2550_v0, %v346_v22  ;;  %v2115_v24 = vpop.eup %2114  ;;  %v1330_v22 = vmul.f32 %v2824_v11, %v1329_v6  ;;  %v1351_v48 = vsel %vm2920_vm11, %v1348_v12, %v1345_v38  ;;  %v4122_v32 = vmax.f32 %v2810_v57, 0.0 }
  0xf2   :  { %v2117_v50 = vpop.eup %2116  ;;  %v748_v21 = vand.u32 2147483647, %v2931_v35  ;;  %v1228_v13 = vmul.f32 0.6931472, %v2115_v24  ;;  %v1567_v3 = vadd.f32 %v1351_v48, %v4120_v36  ;;  %2120 = vpow2.f32 %v841_v62 }
  0xf3   :  { %v704_v14 = vand.u32 2147483647, %v2935_v55  ;;  %v1219_v8 = vmul.f32 0.6931472, %v2117_v50  ;;  %v1333_v5 = vsel %vm1332_vm0, %v1330_v22, %v1327_v61  ;;  %vm603_vm7 = vcmp.ne.f32.partialorder %v2719_v7, %v2719_v7 }
  0xf4   :  { %v1234_v11 = vsel %vm2937_vm13, %v1231_v56, %v1228_v13  ;;  %v1565_v6 = vadd.f32 %v1333_v5, %v541_v39  ;;  %v1631_v28 = vsel %vm607_vm9, %v2827_v60, %v1567_v3  ;;  %v812_v38 = vsub.f32 0.0, %v748_v21 }
  0xf5   :  { %v1554_v12 = vadd.f32 %v1234_v11, %v4121_v20  ;;  %v1225_v45 = vsel %vm2945_vm14, %v1222_v46, %v1219_v8  ;;  %v1971_v40 = vadd.f32 -0.6931472, %v1631_v28  ;;  %v931_v60 = vmul.f32 1.442695, %v811_v51  ;;  %v3005_v20 = vpop.eup %2118 }
  0xf6   :  { %v1553_v1 = vadd.f32 %v1225_v45, %v4122_v32  ;;  %v1629_v56 = vsel %vm605_vm15, %v2772_v52, %v1565_v6  ;;  %v768_v24 = vsub.f32 0.0, %v704_v14  ;;  %v843_v51 = vmul.f32 1.442695, %v767_v31 }
  0xf7   :  { %v481_v61 = vpop.f32.mrf.mxu3  ;;  %v1618_v46 = vsel %vm594_vm10, %v2838_v16, %v1554_v12  ;;  %1778 = vmatpush.msrb.mxu3 %v1971_v40  ;;  %v1969_v50 = vadd.f32 -0.6931472, %v1629_v56  ;;  %v933_v13 = vmul.f32 1.442695, %v812_v38  ;;  %v1211_v14 = vmul.f32 -0.5, %v2840_v27 }
  0xf8   :  { %v349_v22 = vpop.f32.mrf.mxu0  ;;  %v1958_v42 = vadd.f32 -0.6931472, %v1618_v46  ;;  %v1617_v52 = vsel %vm593_vm12, %v2810_v57, %v1553_v1  ;;  %v2988_v21 = vadd.f32 %v2550_v0, %v481_v61  ;;  %2122 = vpow2.f32 %v931_v60  ;;  %v3013_v38 = vpop.eup %2120 }
  0xf9   :  { %v2980_v49 = vadd.f32 %v2550_v0, %v349_v22  ;;  %v1957_v48 = vadd.f32 -0.6931472, %v1617_v52  ;;  %1779 = vmatpush.msrb.mxu3 %v1970_v29  ;;  %v845_v36 = vmul.f32 1.442695, %v768_v24  ;;  %v1214_v3 = vand.u32 2147483647, %v2840_v27 }
  0xfa   :  { %1755 = vmatpush.msrb.mxu2 %v1958_v42  ;;  %v1210_v0 = vmul.f32 0.6931472, %v2886_v15  ;;  %v1212_v44 = vadd.f32 1.0, %v1211_v14  ;;  %v1319_v8 = vmul.f32 -0.5, %v2844_v9  ;;  %v1322_v5 = vand.u32 2147483647, %v2844_v9 }
  0xfb   :  { %v705_v57 = vand.u32 2147483647, %v2980_v49  ;;  %1780 = vmatpush.msrb.mxu3 %v1969_v50  ;;  %2124 = vpow2.f32 %v843_v51  ;;  %v749_v62 = vand.u32 2147483647, %v2988_v21  ;;  %v528_v31 = vmax.f32 %v2779_v53, 0.0 }
  0xfc   :  { %1756 = vmatpush.msrb.mxu2 %v1957_v48  ;;  %vm2999_vm1 = vcmp.lt.f32.partialorder %v1214_v3, 0.0004427343  ;;  %2126 = vpow2.f32 %v933_v13  ;;  %v1213_v6 = vmul.f32 %v2840_v27, %v1212_v44  ;;  %v1318_v28 = vmul.f32 0.6931472, %v2890_v34  ;;  %v3039_v14 = vld [vmem:[%s3972_s2] ss:$0 sm:$0xff] }
  0xfd   :  { %v1320_v15 = vadd.f32 1.0, %v1319_v8  ;;  %2128 = vpow2.f32 %v845_v36  ;;  %v540_v12 = vmax.f32 %v2754_v59, 0.0  ;;  %vm3008_vm2 = vcmp.lt.f32.partialorder %v1322_v5, 0.0004427343 }
  0xfe   :  { %v1202_v45 = vmul.f32 -0.5, %v2855_v58  ;;  %v769_v61 = vsub.f32 0.0, %v705_v57  ;;  %v1216_v34 = vsel %vm2999_vm1, %v1213_v6, %v1210_v0  ;;  %v3020_v40 = vpop.eup %2122  ;;  %v813_v1 = vsub.f32 0.0, %v749_v62 }
  0xff   :  { %v1321_v27 = vmul.f32 %v2844_v9, %v1320_v15  ;;  %v1552_v56 = vadd.f32 %v1216_v34, %v528_v31  ;;  %v484_v60 = vpop.f32.mrf.mxu3  ;;  %2130 = vlog2.f32 %v2881_v19  ;;  %v1205_v50 = vand.u32 2147483647, %v2855_v58 }
 0x100   :  { %v1203_v46 = vadd.f32 1.0, %v1202_v45  ;;  %v1307_v51 = vadd.f32 1.0, %v2816_v17  ;;  %v847_v19 = vmul.f32 1.442695, %v769_v61  ;;  %v3042_v36 = vadd.f32 %v3039_v14, %v484_v60 }
 0x101   :  { %v1324_v22 = vsel %vm3008_vm2, %v1321_v27, %v1318_v28  ;;  %v3029_v42 = vpop.eup %2124  ;;  %v1616_v9 = vsel %vm592_vm3, %v2779_v53, %v1552_v56  ;;  %v1310_v57 = vmul.f32 -0.5, %v2816_v17  ;;  %v352_v53 = vpop.f32.mrf.mxu0  ;;  %v3047_v0 = vmul.f32 1.442695, %v813_v1 }
 0x102   :  { %v1564_v52 = vadd.f32 %v1324_v22, %v540_v12  ;;  %v3034_v48 = vpop.eup %2126  ;;  %v1956_v13 = vadd.f32 -0.6931472, %v1616_v9  ;;  %2132 = vlog2.f32 %v1307_v51  ;;  %v1313_v8 = vand.u32 2147483647, %v2816_v17 }
 0x103   :  { %v3045_v3 = vpop.eup %2128  ;;  %v527_v62 = vmax.f32 %v2768_v26, 0.0  ;;  %v1204_v31 = vmul.f32 %v2855_v58, %v1203_v46  ;;  %v1311_v11 = vadd.f32 1.0, %v1310_v57  ;;  %vm3058_vm6 = vcmp.lt.f32.partialorder %v1205_v50, 0.0004427343 }
 0x104   :  { %v1628_v44 = vsel %vm604_vm4, %v2754_v59, %v1564_v52  ;;  %1757 = vmatpush.msrb.mxu2 %v1956_v13  ;;  %v3063_v59 = vadd.f32 %v3039_v14, %v352_v53  ;;  %v1190_v15 = vadd.f32 1.0, %v2832_v37  ;;  %2134 = vpow2.f32 %v847_v19 }
 0x105   :  { %v1968_v5 = vadd.f32 -0.6931472, %v1628_v44  ;;  %v2131_v6 = vpop.eup %2130  ;;  %v750_v12 = vand.u32 2147483647, %v3042_v36  ;;  %v1193_v58 = vmul.f32 -0.5, %v2832_v37  ;;  %v539_v45 = vmax.f32 %v2719_v7, 0.0 }
 0x106   :  { %v1201_v29 = vmul.f32 0.6931472, %v2131_v6  ;;  %vm3071_vm8 = vcmp.lt.f32.partialorder %v1313_v8, 0.0004427343  ;;  %2136 = vlog2.f32 %v1190_v15  ;;  %v1312_v27 = vmul.f32 %v2816_v17, %v1311_v11 }
 0x107   :  { %1781 = vmatpush.msrb.mxu3 %v1968_v5  ;;  %v1194_v1 = vadd.f32 1.0, %v1193_v58  ;;  %v1298_v56 = vadd.f32 1.0, %v2792_v41  ;;  %v706_v46 = vand.u32 2147483647, %v3063_v59  ;;  %v1196_v9 = vand.u32 2147483647, %v2832_v37 }
 0x108   :  { %v1207_v34 = vsel %vm3058_vm6, %v1204_v31, %v1201_v29  ;;  %v2133_v60 = vpop.eup %2132  ;;  %v1301_v52 = vmul.f32 -0.5, %v2792_v41  ;;  %v3082_v50 = vsub.f32 0.0, %v750_v12  ;;  %v1304_v19 = vand.u32 2147483647, %v2792_v41 }
 0x109   :  { %v1551_v22 = vadd.f32 %v1207_v34, %v527_v62  ;;  %v1309_v51 = vmul.f32 0.6931472, %v2133_v60  ;;  %2138 = vlog2.f32 %v1298_v56  ;;  %v526_v13 = vmax.f32 %v2749_v54, 0.0 }
 0x10a   :  { %vm590_vm9 = vcmp.ne.f32.partialorder %v2749_v54, %v2749_v54  ;;  %v1302_v57 = vadd.f32 1.0, %v1301_v52  ;;  %v3092_v53 = vpop.eup %2134  ;;  %v1195_v5 = vmul.f32 %v2832_v37, %v1194_v1  ;;  %v1181_v62 = vadd.f32 1.0, %v2812_v4 }
 0x10b   :  { %v1615_v17 = vsel %vm591_vm5, %v2768_v26, %v1551_v22  ;;  %v1315_v8 = vsel %vm3071_vm8, %v1312_v27, %v1309_v51  ;;  %v770_v6 = vsub.f32 0.0, %v706_v46  ;;  %vm3098_vm10 = vcmp.lt.f32.partialorder %v1196_v9, 0.0004427343 }
 0x10c   :  { %v1955_v44 = vadd.f32 -0.6931472, %v1615_v17  ;;  %v2137_v31 = vpop.eup %2136  ;;  %v1563_v11 = vadd.f32 %v1315_v8, %v539_v45  ;;  %v1184_v28 = vmul.f32 -0.5, %v2812_v4  ;;  %v538_v12 = vmax.f32 %v2679_v10, 0.0 }
 0x10d   :  { %v1192_v15 = vmul.f32 0.6931472, %v2137_v31  ;;  %vm3104_vm11 = vcmp.lt.f32.partialorder %v1304_v19, 0.0004427343  ;;  %2140 = vlog2.f32 %v1181_v62  ;;  %v1303_v58 = vmul.f32 %v2792_v41, %v1302_v57 }
 0x10e   :  { %1758 = vmatpush.msrb.mxu2 %v1955_v44  ;;  %v1627_v37 = vsel %vm603_vm7, %v2719_v7, %v1563_v11  ;;  %v1185_v45 = vadd.f32 1.0, %v1184_v28  ;;  %v1289_v61 = vadd.f32 1.0, %v2756_v2  ;;  %v1187_v56 = vand.u32 2147483647, %v2812_v4 }
 0x10f   :  { %v2139_v34 = vpop.eup %2138  ;;  %v1967_v27 = vadd.f32 -0.6931472, %v1627_v37  ;;  %v1198_v1 = vsel %vm3098_vm10, %v1195_v5, %v1192_v15  ;;  %v1292_v60 = vmul.f32 -0.5, %v2756_v2  ;;  %vm602_vm12 = vcmp.ne.f32.partialorder %v2679_v10, %v2679_v10 }
 0x110   :  { %v1550_v22 = vadd.f32 %v1198_v1, %v526_v13  ;;  %v1300_v46 = vmul.f32 0.6931472, %v2139_v34  ;;  %2142 = vlog2.f32 %v1289_v61  ;;  %v525_v41 = vmax.f32 %v2714_v63, 0.0  ;;  %v487_v1 = vpop.f32.mrf.mxu3 }
 0x111   :  { %1782 = vmatpush.msrb.mxu3 %v1967_v27  ;;  %v1186_v7 = vmul.f32 %v2812_v4, %v1185_v45  ;;  %v1293_v9 = vadd.f32 1.0, %v1292_v60  ;;  %v1295_v52 = vand.u32 2147483647, %v2756_v2  ;;  %v1172_v17 = vadd.f32 1.0, %v2781_v33 }
 0x112   :  { %v1614_v51 = vsel %vm590_vm9, %v2749_v54, %v1550_v22  ;;  %v1306_v19 = vsel %vm3104_vm11, %v1303_v58, %v1300_v46  ;;  %v1175_v13 = vmul.f32 -0.5, %v2781_v33  ;;  %vm589_vm13 = vcmp.ne.f32.partialorder %v2714_v63, %v2714_v63 }
 0x113   :  { %v2141_v57 = vpop.eup %2140  ;;  %v1954_v44 = vadd.f32 -0.6931472, %v1614_v51  ;;  %v1562_v8 = vadd.f32 %v1306_v19, %v538_v12  ;;  %vm3133_vm14 = vcmp.lt.f32.partialorder %v1187_v56, 0.0004427343  ;;  %v537_v54 = vmax.f32 %v2642_v18, 0.0 }
 0x114   :  { %v1183_v5 = vmul.f32 0.6931472, %v2141_v57  ;;  %2144 = vlog2.f32 %v1172_v17  ;;  %v1176_v62 = vadd.f32 1.0, %v1175_v13  ;;  %v1294_v11 = vmul.f32 %v2756_v2, %v1293_v9  ;;  %v355_v9 = vpop.f32.mrf.mxu0  ;;  %v4141_v17 = vld [vmem:[#allocation11_spill] sm:$0xff] }
 0x115   :  { %1759 = vmatpush.msrb.mxu2 %v1954_v44  ;;  %v1626_v31 = vsel %vm602_vm12, %v2679_v10, %v1562_v8  ;;  %vm3143_vm15 = vcmp.lt.f32.partialorder %v1295_v52, 0.0004427343  ;;  %v1280_v28 = vadd.f32 1.0, %v2721_v25  ;;  %v1178_v37 = vand.u32 2147483647, %v2781_v33 }
 0x116   :  { %v2143_v15 = vpop.eup %2142  ;;  %v1966_v12 = vadd.f32 -0.6931472, %v1626_v31  ;;  %v1189_v29 = vsel %vm3133_vm14, %v1186_v7, %v1183_v5  ;;  %v1283_v58 = vmul.f32 -0.5, %v2721_v25  ;;  %v849_v45 = vmul.f32 1.442695, %v770_v6 }
 0x117   :  { %v1549_v61 = vadd.f32 %v1189_v29, %v525_v41  ;;  %v1291_v10 = vmul.f32 0.6931472, %v2143_v15  ;;  %2146 = vlog2.f32 %v1280_v28  ;;  %vm601_vm0 = vcmp.ne.f32.partialorder %v2642_v18, %v2642_v18  ;;  %v4145_v28 = vld [vmem:[#allocation13_spill] sm:$0xff] }
 0x118   :  { %1783 = vmatpush.msrb.mxu3 %v1966_v12  ;;  %v524_v2 = vmax.f32 %v2662_v47, 0.0  ;;  %v1177_v34 = vmul.f32 %v2781_v33, %v1176_v62  ;;  %v1284_v27 = vadd.f32 1.0, %v1283_v58  ;;  %v1286_v60 = vand.u32 2147483647, %v2721_v25 }
 0x119   :  { %v1613_v56 = vsel %vm589_vm13, %v2714_v63, %v1549_v61  ;;  %v1297_v6 = vsel %vm3143_vm15, %v1294_v11, %v1291_v10  ;;  %v1163_v22 = vadd.f32 1.0, %v2733_v43  ;;  %vm588_vm1 = vcmp.ne.f32.partialorder %v2662_v47, %v2662_v47  ;;  %v4144_v11 = vld [vmem:[#allocation21_spill] sm:$0xff] }
 0x11a   :  { %v2145_v46 = vpop.eup %2144  ;;  %v1953_v41 = vadd.f32 -0.6931472, %v1613_v56  ;;  %v1561_v7 = vadd.f32 %v1297_v6, %v537_v54  ;;  %vm3166_vm2 = vcmp.lt.f32.partialorder %v1178_v37, 0.0004427343  ;;  %v3171_v63 = vadd.f32 %v3039_v14, %v487_v1 }
 0x11b   :  { %v1174_v52 = vmul.f32 0.6931472, %v2145_v46  ;;  %2148 = vlog2.f32 %v1163_v22  ;;  %v1166_v51 = vmul.f32 -0.5, %v2733_v43  ;;  %v536_v13 = vmax.f32 %v4141_v17, 0.0  ;;  %v4150_v46 = vld [vmem:[#allocation25_spill] sm:$0xff] }
 0x11c   :  { %1760 = vmatpush.msrb.mxu2 %v1953_v41  ;;  %v1625_v19 = vsel %vm601_vm0, %v2642_v18, %v1561_v7  ;;  %v1285_v57 = vmul.f32 %v2721_v25, %v1284_v27  ;;  %v1169_v44 = vand.u32 2147483647, %v2733_v43  ;;  %vm3183_vm3 = vcmp.lt.f32.partialorder %v1286_v60, 0.0004427343  ;;  %v4149_v60 = vld [vmem:[#allocation8_spill] sm:$0xff]  ;;  %v490_v7 = vpop.f32.mrf.mxu3 }
 0x11d   :  { %v2147_v8 = vpop.eup %2146  ;;  %v1965_v4 = vadd.f32 -0.6931472, %v1625_v19  ;;  %v1180_v5 = vsel %vm3166_vm2, %v1177_v34, %v1174_v52  ;;  %v1167_v62 = vadd.f32 1.0, %v1166_v51  ;;  %vm600_vm4 = vcmp.ne.f32.partialorder %v4141_v17, %v4141_v17  ;;  %v358_v52 = vpop.f32.mrf.mxu0 }
 0x11e   :  { %v1548_v31 = vadd.f32 %v1180_v5, %v524_v2  ;;  %v1282_v18 = vmul.f32 0.6931472, %v2147_v8  ;;  %v1271_v26 = vadd.f32 1.0, %v4144_v11  ;;  %v751_v25 = vand.u32 2147483647, %v3171_v63  ;;  %v4153_v8 = vld [vmem:[#allocation16_spill] sm:$0xff] }
 0x11f   :  { %1784 = vmatpush.msrb.mxu3 %v1965_v4  ;;  %v523_v15 = vmax.f32 %v4145_v28, 0.0  ;;  %vm3192_vm5 = vcmp.lt.f32.partialorder %v1169_v44, 0.0004427343  ;;  %v1274_v29 = vmul.f32 -0.5, %v4144_v11  ;;  %v1168_v61 = vmul.f32 %v2733_v43, %v1167_v62 }
 0x120   :  { %v1612_v37 = vsel %vm588_vm1, %v2662_v47, %v1548_v31  ;;  %v1288_v58 = vsel %vm3183_vm3, %v1285_v57, %v1282_v18  ;;  %2150 = vlog2.f32 %v1271_v26  ;;  %v3205_v1 = vadd.f32 %v3039_v14, %v355_v9 }
 0x121   :  { %v2149_v10 = vpop.eup %2148  ;;  %v1952_v2 = vadd.f32 -0.6931472, %v1612_v37  ;;  %v1560_v34 = vadd.f32 %v1288_v58, %v536_v13  ;;  %v1275_v27 = vadd.f32 1.0, %v1274_v29  ;;  %v3208_v56 = vmul.f32 1.442695, %v3082_v50 }
 0x122   :  { %4148 = vst [vmem:[#allocation11_spill] sm:$0xff] %v3205_v1  ;;  %2152 = vpow2.f32 %v849_v45  ;;  %v1165_v6 = vmul.f32 0.6931472, %v2149_v10  ;;  %v1277_v47 = vand.u32 2147483647, %v4144_v11  ;;  %vm587_vm6 = vcmp.ne.f32.partialorder %v4145_v28, %v4145_v28  ;;  %v4155_v10 = vld [vmem:[#allocation20_spill] sm:$0xff] }
 0x123   :  { %1761 = vmatpush.msrb.mxu2 %v1952_v2  ;;  %v1624_v43 = vsel %vm600_vm4, %v4141_v17, %v1560_v34  ;;  %v535_v22 = vmax.f32 %v4149_v60, 0.0  ;;  %v1154_v41 = vadd.f32 1.0, %v4150_v46  ;;  %v815_v33 = vsub.f32 0.0, %v751_v25  ;;  %v4154_v25 = vld [vmem:[#allocation10_spill] sm:$0xff] }
 0x124   :  { %v1964_v50 = vadd.f32 -0.6931472, %v1624_v43  ;;  %v1171_v45 = vsel %vm3192_vm5, %v1168_v61, %v1165_v6  ;;  %v1157_v9 = vmul.f32 -0.5, %v4150_v46  ;;  %v1276_v19 = vmul.f32 %v4144_v11, %v1275_v27  ;;  %v4158_v6 = vld [vmem:[#allocation5_spill] sm:$0xff] }
 0x125   :  { %v1547_v51 = vadd.f32 %v1171_v45, %v523_v15  ;;  %v707_v17 = vand.u32 2147483647, %v3205_v1  ;;  %2154 = vlog2.f32 %v1154_v41  ;;  %vm599_vm7 = vcmp.ne.f32.partialorder %v4149_v60, %v4149_v60 }
 0x126   :  { %v2151_v13 = vpop.eup %2150  ;;  %1785 = vmatpush.msrb.mxu3 %v1964_v50  ;;  %vm3226_vm8 = vcmp.lt.f32.partialorder %v1277_v47, 0.0004427343  ;;  %v1158_v44 = vadd.f32 1.0, %v1157_v9  ;;  %v1262_v4 = vadd.f32 1.0, %v4153_v8  ;;  %v1160_v62 = vand.u32 2147483647, %v4150_v46  ;;  %v403_v50 = vpop.f32.mrf.mxu1 }
 0x127   :  { %v1611_v5 = vsel %vm587_vm6, %v4145_v28, %v1547_v51  ;;  %v1273_v54 = vmul.f32 0.6931472, %v2151_v13  ;;  %v1265_v31 = vmul.f32 -0.5, %v4153_v8  ;;  %v3239_v11 = vmul.f32 1.442695, %v815_v33  ;;  %v4161_v51 = vld [vmem:[#allocation15_spill] sm:$0xff] }
 0x128   :  { %v3237_v18 = vpop.eup %2152  ;;  %v1951_v26 = vadd.f32 -0.6931472, %v1611_v5  ;;  %v522_v15 = vmax.f32 %v4154_v25, 0.0  ;;  %vm586_vm9 = vcmp.ne.f32.partialorder %v4154_v25, %v4154_v25  ;;  %v3246_v29 = vsub.f32 0.0, %v707_v17  ;;  %v493_v17 = vpop.f32.mrf.mxu3 }
 0x129   :  { %v1279_v12 = vsel %vm3226_vm8, %v1276_v19, %v1273_v54  ;;  %2156 = vlog2.f32 %v1262_v4  ;;  %v1268_v28 = vand.u32 2147483647, %v4153_v8  ;;  %v1159_v58 = vmul.f32 %v4150_v46, %v1158_v44  ;;  %v361_v4 = vpop.f32.mrf.mxu0 }
 0x12a   :  { %1762 = vmatpush.msrb.mxu2 %v1951_v26  ;;  %v1559_v37 = vadd.f32 %v1279_v12, %v535_v22  ;;  %v1266_v61 = vadd.f32 1.0, %v1265_v31  ;;  %v1145_v2 = vadd.f32 1.0, %v4155_v10  ;;  %vm3251_vm10 = vcmp.lt.f32.partialorder %v1160_v62, 0.0004427343  ;;  %v4164_v12 = vld [vmem:[#allocation7_spill] sm:$0xff] }
 0x12b   :  { %v2155_v34 = vpop.eup %2154  ;;  %v534_v47 = vmax.f32 %v4158_v6, 0.0  ;;  %v1148_v43 = vmul.f32 -0.5, %v4155_v10  ;;  %v1151_v41 = vand.u32 2147483647, %v4155_v10  ;;  %vm598_vm11 = vcmp.ne.f32.partialorder %v4158_v6, %v4158_v6 }
 0x12c   :  { %v1623_v22 = vsel %vm599_vm7, %v4149_v60, %v1559_v37  ;;  %v1156_v46 = vmul.f32 0.6931472, %v2155_v34  ;;  %2158 = vlog2.f32 %v1145_v2  ;;  %vm3264_vm12 = vcmp.lt.f32.partialorder %v1268_v28, 0.0004427343 }
 0x12d   :  { %v1963_v33 = vadd.f32 -0.6931472, %v1623_v22  ;;  %v1149_v9 = vadd.f32 1.0, %v1148_v43  ;;  %v1136_v19 = vadd.f32 1.0, %v4161_v51  ;;  %v1267_v60 = vmul.f32 %v4153_v8, %v1266_v61 }
 0x12e   :  { %v1162_v13 = vsel %vm3251_vm10, %v1159_v58, %v1156_v46  ;;  %v1139_v57 = vmul.f32 -0.5, %v4161_v51  ;;  %v3274_v44 = vadd.f32 %v3039_v14, %v490_v7  ;;  %vm3276_vm13 = vcmp.lt.f32.partialorder %v1151_v41, 0.0004427343 }
 0x12f   :  { %v2157_v5 = vpop.eup %2156  ;;  %1786 = vmatpush.msrb.mxu3 %v1963_v33  ;;  %v1546_v54 = vadd.f32 %v1162_v13, %v522_v15  ;;  %2160 = vlog2.f32 %v1136_v19  ;;  %v3281_v31 = vadd.f32 %v3039_v14, %v358_v52  ;;  %v521_v8 = vmax.f32 %v4164_v12, 0.0 }
 0x130   :  { %v1264_v26 = vmul.f32 0.6931472, %v2157_v5  ;;  %v1140_v28 = vadd.f32 1.0, %v1139_v57  ;;  %v1142_v37 = vand.u32 2147483647, %v4161_v51  ;;  %v1150_v15 = vmul.f32 %v4155_v10, %v1149_v9  ;;  %v4165_v10 = vld [vmem:[#allocation4_spill] sm:$0xff]  ;;  %v496_v62 = vpop.f32.mrf.mxu3 }
 0x131   :  { %v1610_v7 = vsel %vm586_vm9, %v4154_v25, %v1546_v54  ;;  %v752_v58 = vand.u32 2147483647, %v3274_v44  ;;  %v3292_v61 = vadd.f32 %v3039_v14, %v403_v50  ;;  %v708_v27 = vand.u32 2147483647, %v3281_v31 }
 0x132   :  { %v2159_v52 = vpop.eup %2158  ;;  %v1950_v2 = vadd.f32 -0.6931472, %v1610_v7  ;;  %v1270_v34 = vsel %vm3264_vm12, %v1267_v60, %v1264_v26  ;;  %v3298_v43 = vadd.f32 %v3039_v14, %v493_v17  ;;  %vm585_vm14 = vcmp.ne.f32.partialorder %v4164_v12, %v4164_v12  ;;  %v364_v7 = vpop.f32.mrf.mxu0 }
 0x133   :  { %v1558_v41 = vadd.f32 %v1270_v34, %v534_v47  ;;  %v1147_v25 = vmul.f32 0.6931472, %v2159_v52  ;;  %v520_v22 = vmax.f32 %v4165_v10, 0.0  ;;  %v1141_v46 = vmul.f32 %v4161_v51, %v1140_v28 }
 0x134   :  { %1763 = vmatpush.msrb.mxu2 %v1950_v2  ;;  %v723_v50 = vand.u32 2147483647, %v3292_v61  ;;  %v753_v33 = vand.u32 2147483647, %v3298_v43  ;;  %v3307_v45 = vadd.f32 %v3039_v14, %v361_v4  ;;  %vm3315_vm15 = vcmp.lt.f32.partialorder %v1142_v37, 0.0004427343  ;;  %v406_v4 = vpop.f32.mrf.mxu1 }
 0x135   :  { %v2161_v9 = vpop.eup %2160  ;;  %v1622_v47 = vsel %vm598_vm11, %v4158_v6, %v1558_v41  ;;  %v1153_v19 = vsel %vm3276_vm13, %v1150_v15, %v1147_v25  ;;  %v816_v51 = vsub.f32 0.0, %v752_v58  ;;  %v772_v5 = vsub.f32 0.0, %v708_v27 }
 0x136   :  { %v1962_v13 = vadd.f32 -0.6931472, %v1622_v47  ;;  %v1545_v60 = vadd.f32 %v1153_v19, %v521_v8  ;;  %v1138_v57 = vmul.f32 0.6931472, %v2161_v9  ;;  %v851_v54 = vmul.f32 1.442695, %v3246_v29 }
 0x137   :  { %vm584_vm0 = vcmp.ne.f32.partialorder %v4165_v10, %v4165_v10  ;;  %v787_v26 = vsub.f32 0.0, %v723_v50  ;;  %v3323_v6 = vadd.f32 %v3039_v14, %v406_v4  ;;  %v817_v37 = vsub.f32 0.0, %v753_v33 }
 0x138   :  { %1787 = vmatpush.msrb.mxu3 %v1962_v13  ;;  %v1609_v28 = vsel %vm585_vm14, %v4164_v12, %v1545_v60  ;;  %v1144_v8 = vsel %vm3315_vm15, %v1141_v46, %v1138_v57  ;;  %v709_v29 = vand.u32 2147483647, %v3307_v45  ;;  %2162 = vpow2.f32 %v3047_v0  ;;  %v4170_v46 = vld [vmem:[#allocation51_spill] sm:$0xff] }
 0x139   :  { %v1949_v15 = vadd.f32 -0.6931472, %v1609_v28  ;;  %v1544_v58 = vadd.f32 %v1144_v8, %v520_v22  ;;  %v941_v52 = vmul.f32 1.442695, %v816_v51  ;;  %2164 = vpow2.f32 %v3208_v56 }
 0x13a   :  { %v853_v2 = vmul.f32 1.442695, %v772_v5  ;;  %v724_v34 = vand.u32 2147483647, %v3323_v6  ;;  %v3336_v27 = vadd.f32 %v3039_v14, %v496_v62  ;;  %2166 = vpow2.f32 %v3239_v11 }
 0x13b   :  { %1764 = vmatpush.msrb.mxu2 %v1949_v15  ;;  %v1608_v12 = vsel %vm584_vm0, %v4165_v10, %v1544_v58  ;;  %v883_v0 = vmul.f32 1.442695, %v787_v26  ;;  %v3344_v41 = vadd.f32 %v3039_v14, %v364_v7  ;;  %2168 = vpow2.f32 %v851_v54 }
 0x13c   :  { %v1948_v56 = vadd.f32 -0.6931472, %v1608_v12  ;;  %v943_v25 = vmul.f32 1.442695, %v817_v37  ;;  %v773_v22 = vsub.f32 0.0, %v709_v29  ;;  %2170 = vpow2.f32 %v941_v52  ;;  %v409_v4 = vpop.f32.mrf.mxu1 }
 0x13d   :  { %v788_v50 = vsub.f32 0.0, %v724_v34  ;;  %v754_v11 = vand.u32 2147483647, %v3336_v27  ;;  %2172 = vpow2.f32 %v853_v2  ;;  %v1082_v10 = vadd.f32 1.0, %v3237_v18 }
 0x13e   :  { %1765 = vmatpush.msrb.mxu2 %v1948_v56  ;;  %v3351_v47 = vpop.eup %2162  ;;  %2174 = vpow2.f32 %v883_v0  ;;  %v710_v17 = vand.u32 2147483647, %v3344_v41  ;;  %v1085_v51 = vmul.f32 -0.5, %v3237_v18  ;;  %v855_v57 = vmul.f32 1.442695, %v773_v22 }
 0x13f   :  { %v818_v19 = vsub.f32 0.0, %v754_v11  ;;  %v3355_v13 = vpop.eup %2164  ;;  %2176 = vpow2.f32 %v943_v25  ;;  %v1073_v5 = vadd.f32 1.0, %v3092_v53  ;;  %v885_v26 = vmul.f32 1.442695, %v788_v50 }
 0x140   :  { %v3359_v54 = vpop.eup %2166  ;;  %2178 = vlog2.f32 %v1082_v10  ;;  %v1076_v28 = vmul.f32 -0.5, %v3092_v53  ;;  %v562_v37 = vmax.f32 %v3336_v27, 0.0  ;;  %v514_v29 = vmax.f32 %v3063_v59, 0.0 }
 0x141   :  { %v945_v62 = vmul.f32 1.442695, %v818_v19  ;;  %v3362_v8 = vpop.eup %2168  ;;  %v1088_v7 = vand.u32 2147483647, %v3237_v18  ;;  %2180 = vlog2.f32 %v1073_v5  ;;  %v774_v58 = vsub.f32 0.0, %v710_v17  ;;  %v367_v17 = vpop.f32.mrf.mxu0 }
 0x142   :  { %v3367_v15 = vpop.eup %2170  ;;  %v1086_v52 = vadd.f32 1.0, %v1085_v51  ;;  %v3370_v2 = vadd.f32 %v3039_v14, %v409_v4  ;;  %vm578_vm1 = vcmp.ne.f32.partialorder %v3063_v59, %v3063_v59  ;;  %v513_v12 = vmax.f32 %v2980_v49, 0.0 }
 0x143   :  { %2182 = vpow2.f32 %v945_v62  ;;  %v3372_v34 = vpop.eup %2172  ;;  %v1064_v0 = vadd.f32 1.0, %v3045_v3  ;;  %vm577_vm2 = vcmp.ne.f32.partialorder %v2980_v49, %v2980_v49  ;;  %v1077_v25 = vadd.f32 1.0, %v1076_v28 }
 0x144   :  { %2184 = vpow2.f32 %v855_v57  ;;  %v3378_v56 = vpop.eup %2174  ;;  %v1067_v22 = vmul.f32 -0.5, %v3045_v3  ;;  %vm3385_vm3 = vcmp.lt.f32.partialorder %v1088_v7, 0.0004427343  ;;  %v1079_v10 = vand.u32 2147483647, %v3092_v53 }
 0x145   :  { %2186 = vpow2.f32 %v885_v26  ;;  %v3383_v50 = vpop.eup %2176  ;;  %v1055_v19 = vadd.f32 1.0, %v3029_v42  ;;  %v857_v57 = vmul.f32 1.442695, %v774_v58  ;;  %v1087_v5 = vmul.f32 %v3237_v18, %v1086_v52 }
 0x146   :  { %2188 = vlog2.f32 %v1064_v0  ;;  %v2179_v51 = vpop.eup %2178  ;;  %v725_v4 = vand.u32 2147483647, %v3370_v2  ;;  %v1058_v26 = vmul.f32 -0.5, %v3029_v42  ;;  %v512_v7 = vmax.f32 %v2935_v55, 0.0 }
 0x147   :  { %v2181_v62 = vpop.eup %2180  ;;  %v1084_v28 = vmul.f32 0.6931472, %v2179_v51  ;;  %v1070_v39 = vand.u32 2147483647, %v3045_v3  ;;  %2190 = vlog2.f32 %v1055_v19  ;;  %v1078_v32 = vmul.f32 %v3092_v53, %v1077_v25 }
 0x148   :  { %v1075_v0 = vmul.f32 0.6931472, %v2181_v62  ;;  %vm576_vm4 = vcmp.ne.f32.partialorder %v2935_v55, %v2935_v55  ;;  %v1068_v58 = vadd.f32 1.0, %v1067_v22  ;;  %v3400_v18 = vadd.f32 %v3039_v14, %v367_v17 }
 0x149   :  { %v2183_v16 = vpop.eup %2182  ;;  %v1090_v51 = vsel %vm3385_vm3, %v1087_v5, %v1084_v28  ;;  %vm1080_vm5 = vcmp.lt.f32.partialorder %v1079_v10, 0.0004427343  ;;  %v511_v19 = vmax.f32 %v4170_v46, 0.0  ;;  %v789_v25 = vsub.f32 0.0, %v725_v4 }
 0x14a   :  { %v3402_v52 = vpop.eup %2184  ;;  %v1514_v24 = vadd.f32 1.0, %v2183_v16  ;;  %v1538_v62 = vadd.f32 %v1090_v51, %v514_v29  ;;  %v1081_v53 = vsel %vm1080_vm5, %v1078_v32, %v1075_v0  ;;  %v1059_v9 = vadd.f32 1.0, %v1058_v26 }
 0x14b   :  { %v3407_v33 = vpop.eup %2186  ;;  %v1537_v22 = vadd.f32 %v1081_v53, %v513_v12  ;;  %vm3409_vm6 = vcmp.lt.f32.partialorder %v1070_v39, 0.0004427343  ;;  %v1061_v17 = vand.u32 2147483647, %v3029_v42  ;;  %v1069_v29 = vmul.f32 %v3045_v3, %v1068_v58 }
 0x14c   :  { %v2189_v60 = vpop.eup %2188  ;;  %2192 = vlog2.f32 %v1514_v24  ;;  %v1602_v11 = vsel %vm578_vm1, %v3063_v59, %v1538_v62  ;;  %v711_v32 = vand.u32 2147483647, %v3400_v18  ;;  %v1517_v4 = vmul.f32 -0.5, %v2183_v16 }
 0x14d   :  { %v1066_v10 = vmul.f32 0.6931472, %v2189_v60  ;;  %v2191_v5 = vpop.eup %2190  ;;  %v1520_v24 = vand.u32 2147483647, %v2183_v16  ;;  %v1942_v12 = vadd.f32 -0.6931472, %v1602_v11  ;;  %v1601_v39 = vsel %vm577_vm2, %v2980_v49, %v1537_v22 }
 0x14e   :  { %v1057_v28 = vmul.f32 0.6931472, %v2191_v5  ;;  %v1060_v59 = vmul.f32 %v3029_v42, %v1059_v9  ;;  %v775_v60 = vsub.f32 0.0, %v711_v32  ;;  %v1941_v3 = vadd.f32 -0.6931472, %v1601_v39 }
 0x14f   :  { %v1072_v26 = vsel %vm3409_vm6, %v1069_v29, %v1066_v10  ;;  %1735 = vmatpush.msrb.mxu1 %v1942_v12  ;;  %vm1062_vm7 = vcmp.lt.f32.partialorder %v1061_v17, 0.0004427343  ;;  %v1046_v58 = vadd.f32 1.0, %v3013_v38  ;;  %2194 = vpow2.f32 %v857_v57  ;;  %v4175_v17 = vld [vmem:[#allocation53_spill] sm:$0xff] }
 0x150   :  { %v1536_v0 = vadd.f32 %v1072_v26, %v512_v7  ;;  %v887_v51 = vmul.f32 1.442695, %v789_v25  ;;  %v1063_v62 = vsel %vm1062_vm7, %v1060_v59, %v1057_v28  ;;  %v1049_v53 = vmul.f32 -0.5, %v3013_v38  ;;  %v4178_v26 = vld [vmem:[#allocation49_spill] sm:$0xff] }
 0x151   :  { %v1518_v49 = vadd.f32 1.0, %v1517_v4  ;;  %1736 = vmatpush.msrb.mxu1 %v1941_v3  ;;  %v1535_v9 = vadd.f32 %v1063_v62, %v511_v19  ;;  %2196 = vlog2.f32 %v1046_v58  ;;  %vm3433_vm8 = vcmp.lt.f32.partialorder %v1520_v24, 0.0004427343  ;;  %v4176_v4 = vld [vmem:[#allocation50_spill] sm:$0xff]  ;;  %v4179_v58 = vld [vmem:[#allocation47_spill] sm:$0xff] }
 0x152   :  { %v2193_v11 = vpop.eup %2192  ;;  %v1600_v42 = vsel %vm576_vm4, %v2935_v55, %v1536_v0  ;;  %vm575_vm9 = vcmp.ne.f32.partialorder %v4170_v46, %v4170_v46  ;;  %v859_v57 = vmul.f32 1.442695, %v775_v60  ;;  %v1037_v10 = vadd.f32 1.0, %v4175_v17 }
 0x153   :  { %v1940_v22 = vadd.f32 -0.6931472, %v1600_v42  ;;  %v1516_v25 = vmul.f32 0.6931472, %v2193_v11  ;;  %v1599_v14 = vsel %vm575_vm9, %v4170_v46, %v1535_v9  ;;  %v1040_v29 = vmul.f32 -0.5, %v4175_v17  ;;  %v4177_v46 = vld [vmem:[#allocation42_spill] sm:$0xff] }
 0x154   :  { %2198 = vpow2.f32 %v887_v51  ;;  %v1939_v55 = vadd.f32 -0.6931472, %v1599_v14  ;;  %v1050_v19 = vadd.f32 1.0, %v1049_v53  ;;  %v1052_v32 = vand.u32 2147483647, %v3013_v38  ;;  %v4180_v11 = vld [vmem:[#allocation38_spill] sm:$0xff] }
 0x155   :  { %1737 = vmatpush.msrb.mxu1 %v1940_v22  ;;  %v1519_v5 = vmul.f32 %v2183_v16, %v1518_v49  ;;  %v510_v24 = vmax.f32 %v4176_v4, 0.0  ;;  %vm574_vm10 = vcmp.ne.f32.partialorder %v4176_v4, %v4176_v4  ;;  %2200 = vlog2.f32 %v1037_v10  ;;  %v3446_v12 = vpop.eup %2194 }
 0x156   :  { %2202 = vpow2.f32 %v859_v57  ;;  %v509_v39 = vmax.f32 %v4177_v46, 0.0  ;;  %v1028_v28 = vadd.f32 1.0, %v4178_v26  ;;  %v1031_v59 = vmul.f32 -0.5, %v4178_v26 }
 0x157   :  { %1738 = vmatpush.msrb.mxu1 %v1939_v55  ;;  %v2197_v60 = vpop.eup %2196  ;;  %v1522_v16 = vsel %vm3433_vm8, %v1519_v5, %v1516_v25  ;;  %v1041_v3 = vadd.f32 1.0, %v1040_v29  ;;  %v1043_v0 = vand.u32 2147483647, %v4175_v17  ;;  %v1019_v51 = vadd.f32 1.0, %v4179_v58  ;;  %v4181_v25 = vld [vmem:[#allocation44_spill] sm:$0xff] }
 0x158   :  { %v1048_v62 = vmul.f32 0.6931472, %v2197_v60  ;;  %v1051_v53 = vmul.f32 %v3013_v38, %v1050_v19  ;;  %vm1053_vm11 = vcmp.lt.f32.partialorder %v1052_v32, 0.0004427343  ;;  %vm573_vm12 = vcmp.ne.f32.partialorder %v4177_v46, %v4177_v46 }
 0x159   :  { %2204 = vlog2.f32 %v1028_v28  ;;  %v508_v49 = vmax.f32 %v4180_v11, 0.0  ;;  %v1034_v42 = vand.u32 2147483647, %v4178_v26  ;;  %v1022_v9 = vmul.f32 -0.5, %v4179_v58  ;;  %v4184_v28 = vld [vmem:[#allocation34_spill] sm:$0xff] }
 0x15a   :  { %2206 = vlog2.f32 %v1019_v51  ;;  %v3461_v7 = vpop.eup %2198  ;;  %v3465_v22 = vadd.f32 %v1522_v16, %v562_v37  ;;  %v1054_v57 = vsel %vm1053_vm11, %v1051_v53, %v1048_v62  ;;  %v1032_v38 = vadd.f32 1.0, %v1031_v59  ;;  %v4187_v53 = vld [vmem:[#allocation40_spill] sm:$0xff] }
 0x15b   :  { %v1010_v14 = vadd.f32 1.0, %v4181_v25  ;;  %v2201_v10 = vpop.eup %2200  ;;  %v1534_v29 = vadd.f32 %v1054_v57, %v510_v24  ;;  %v1042_v55 = vmul.f32 %v4175_v17, %v1041_v3  ;;  %vm3469_vm13 = vcmp.lt.f32.partialorder %v1043_v0, 0.0004427343 }
 0x15c   :  { %vm572_vm14 = vcmp.ne.f32.partialorder %v4180_v11, %v4180_v11  ;;  %v1013_v32 = vmul.f32 -0.5, %v4181_v25  ;;  %v3476_v5 = vpop.eup %2202  ;;  %v1039_v37 = vmul.f32 0.6931472, %v2201_v10  ;;  %v507_v59 = vmax.f32 %v4184_v28, 0.0 }
 0x15d   :  { %v1023_v60 = vadd.f32 1.0, %v1022_v9  ;;  %2208 = vlog2.f32 %v1010_v14  ;;  %v1598_v17 = vsel %vm574_vm10, %v4176_v4, %v1534_v29  ;;  %vm3483_vm15 = vcmp.lt.f32.partialorder %v1034_v42, 0.0004427343 }
 0x15e   :  { %vm571_vm0 = vcmp.ne.f32.partialorder %v4184_v28, %v4184_v28  ;;  %v1025_v16 = vand.u32 2147483647, %v4179_v58  ;;  %v1938_v0 = vadd.f32 -0.6931472, %v1598_v17  ;;  %v1045_v51 = vsel %vm3469_vm13, %v1042_v55, %v1039_v37 }
 0x15f   :  { %v2205_v3 = vpop.eup %2204  ;;  %v1033_v62 = vmul.f32 %v4178_v26, %v1032_v38  ;;  %v1001_v9 = vadd.f32 1.0, %v4187_v53  ;;  %v1533_v4 = vadd.f32 %v1045_v51, %v509_v39  ;;  %v1014_v14 = vadd.f32 1.0, %v1013_v32  ;;  %v4188_v39 = vld [vmem:[#allocation30_spill] sm:$0xff]  ;;  %v4189_v51 = vld [vmem:[#allocation36_spill] sm:$0xff] }
 0x160   :  { %v2207_v57 = vpop.eup %2206  ;;  %v1030_v42 = vmul.f32 0.6931472, %v2205_v3  ;;  %v1004_v10 = vmul.f32 -0.5, %v4187_v53  ;;  %1739 = vmatpush.msrb.mxu1 %v1938_v0  ;;  %v1024_v1 = vmul.f32 %v4179_v58, %v1023_v60  ;;  %v1016_v30 = vand.u32 2147483647, %v4181_v25 }
 0x161   :  { %v1021_v29 = vmul.f32 0.6931472, %v2207_v57  ;;  %2210 = vlog2.f32 %v1001_v9  ;;  %v1597_v26 = vsel %vm573_vm12, %v4177_v46, %v1533_v4  ;;  %vm1026_vm1 = vcmp.lt.f32.partialorder %v1025_v16, 0.0004427343  ;;  %v4190_v57 = vld [vmem:[#allocation28_spill] sm:$0xff] }
 0x162   :  { %v1036_v38 = vsel %vm3483_vm15, %v1033_v62, %v1030_v42  ;;  %v506_v55 = vmax.f32 %v4188_v39, 0.0  ;;  %v1937_v32 = vadd.f32 -0.6931472, %v1597_v26  ;;  %v1005_v3 = vadd.f32 1.0, %v1004_v10  ;;  %v4191_v10 = vld [vmem:[#allocation32_spill] sm:$0xff] }
 0x163   :  { %v2209_v19 = vpop.eup %2208  ;;  %v1532_v37 = vadd.f32 %v1036_v38, %v508_v49  ;;  %v1027_v17 = vsel %vm1026_vm1, %v1024_v1, %v1021_v29  ;;  %v1015_v0 = vmul.f32 %v4181_v25, %v1014_v14  ;;  %v992_v9 = vadd.f32 1.0, %v4189_v51 }
 0x164   :  { %v1531_v58 = vadd.f32 %v1027_v17, %v507_v59  ;;  %v1012_v60 = vmul.f32 0.6931472, %v2209_v19  ;;  %1740 = vmatpush.msrb.mxu1 %v1937_v32  ;;  %vm1017_vm2 = vcmp.lt.f32.partialorder %v1016_v30, 0.0004427343  ;;  %v1007_v24 = vand.u32 2147483647, %v4187_v53 }
 0x165   :  { %v1596_v46 = vsel %vm572_vm14, %v4180_v11, %v1532_v37  ;;  %v995_v16 = vmul.f32 -0.5, %v4189_v51  ;;  %2212 = vlog2.f32 %v992_v9  ;;  %vm570_vm3 = vcmp.ne.f32.partialorder %v4188_v39, %v4188_v39  ;;  %v4192_v32 = vld [vmem:[#allocation24_spill] sm:$0xff] }
 0x166   :  { %v1936_v49 = vadd.f32 -0.6931472, %v1596_v46  ;;  %v1595_v1 = vsel %vm571_vm0, %v4184_v28, %v1531_v58  ;;  %v1018_v25 = vsel %vm1017_vm2, %v1015_v0, %v1012_v60  ;;  %v505_v11 = vmax.f32 %v4190_v57, 0.0  ;;  %v4194_v0 = vld [vmem:[#allocation18_spill] sm:$0xff] }
 0x167   :  { %v2211_v59 = vpop.eup %2210  ;;  %v1530_v62 = vadd.f32 %v1018_v25, %v506_v55  ;;  %v1006_v30 = vmul.f32 %v4187_v53, %v1005_v3  ;;  %v1935_v4 = vadd.f32 -0.6931472, %v1595_v1  ;;  %v996_v14 = vadd.f32 1.0, %v995_v16  ;;  %v4193_v3 = vld [vmem:[#allocation27_spill] sm:$0xff]  ;;  %v4195_v25 = vld [vmem:[#allocation22_spill] sm:$0xff] }
 0x168   :  { %1741 = vmatpush.msrb.mxu1 %v1936_v49  ;;  %v1003_v42 = vmul.f32 0.6931472, %v2211_v59  ;;  %v983_v29 = vadd.f32 1.0, %v4191_v10  ;;  %vm569_vm4 = vcmp.ne.f32.partialorder %v4190_v57, %v4190_v57  ;;  %vm1008_vm5 = vcmp.lt.f32.partialorder %v1007_v24, 0.0004427343 }
 0x169   :  { %v1594_v26 = vsel %vm570_vm3, %v4188_v39, %v1530_v62  ;;  %v986_v28 = vmul.f32 -0.5, %v4191_v10  ;;  %v998_v19 = vand.u32 2147483647, %v4189_v51  ;;  %v504_v37 = vmax.f32 %v4192_v32, 0.0 }
 0x16a   :  { %1742 = vmatpush.msrb.mxu1 %v1935_v4  ;;  %v1934_v38 = vadd.f32 -0.6931472, %v1594_v26  ;;  %v1009_v55 = vsel %vm1008_vm5, %v1006_v30, %v1003_v42  ;;  %2214 = vlog2.f32 %v983_v29  ;;  %v989_v17 = vand.u32 2147483647, %v4191_v10 }
 0x16b   :  { %v1529_v53 = vadd.f32 %v1009_v55, %v505_v11  ;;  %v974_v58 = vadd.f32 1.0, %v4193_v3  ;;  %v2213_v39 = vpop.eup %2212  ;;  %vm568_vm6 = vcmp.ne.f32.partialorder %v4192_v32, %v4192_v32  ;;  %v997_v60 = vmul.f32 %v4189_v51, %v996_v14  ;;  %v4198_v11 = vld [vmem:[#allocation12_spill] sm:$0xff] }
 0x16c   :  { %1743 = vmatpush.msrb.mxu1 %v1934_v38  ;;  %v503_v9 = vmax.f32 %v4194_v0, 0.0  ;;  %v977_v46 = vmul.f32 -0.5, %v4193_v3  ;;  %v994_v16 = vmul.f32 0.6931472, %v2213_v39  ;;  %v987_v49 = vadd.f32 1.0, %v986_v28  ;;  %v4199_v38 = vld [vmem:[#allocation19_spill] sm:$0xff] }
 0x16d   :  { %v1593_v24 = vsel %vm569_vm4, %v4190_v57, %v1529_v53  ;;  %2216 = vlog2.f32 %v974_v58  ;;  %vm999_vm7 = vcmp.lt.f32.partialorder %v998_v19, 0.0004427343  ;;  %vm567_vm8 = vcmp.ne.f32.partialorder %v4194_v0, %v4194_v0  ;;  %v4200_v53 = vld [vmem:[#allocation9_spill] sm:$0xff] }
 0x16e   :  { %v1933_v1 = vadd.f32 -0.6931472, %v1593_v24  ;;  %v965_v59 = vadd.f32 1.0, %v4195_v25  ;;  %v1000_v51 = vsel %vm999_vm7, %v997_v60, %v994_v16  ;;  %vm3541_vm9 = vcmp.lt.f32.partialorder %v989_v17, 0.0004427343 }
 0x16f   :  { %v502_v30 = vmax.f32 %v4198_v11, 0.0  ;;  %v968_v4 = vmul.f32 -0.5, %v4195_v25  ;;  %v1528_v42 = vadd.f32 %v1000_v51, %v504_v37  ;;  %vm566_vm10 = vcmp.ne.f32.partialorder %v4198_v11, %v4198_v11 }
 0x170   :  { %v2215_v57 = vpop.eup %2214  ;;  %1744 = vmatpush.msrb.mxu1 %v1933_v1  ;;  %v978_v14 = vadd.f32 1.0, %v977_v46  ;;  %2218 = vlog2.f32 %v965_v59  ;;  %v988_v26 = vmul.f32 %v4191_v10, %v987_v49  ;;  %v980_v28 = vand.u32 2147483647, %v4193_v3  ;;  %v4201_v1 = vld [vmem:[#allocation6_spill] sm:$0xff] }
 0x171   :  { %v985_v29 = vmul.f32 0.6931472, %v2215_v57  ;;  %v956_v55 = vadd.f32 1.0, %v4199_v38  ;;  %vm626_vm11 = vcmp.ne.f32.partialorder %v3336_v27, %v3336_v27  ;;  %v1592_v19 = vsel %vm568_vm6, %v4192_v32, %v1528_v42 }
 0x172   :  { %v501_v37 = vmax.f32 %v4200_v53, 0.0  ;;  %v969_v17 = vadd.f32 1.0, %v968_v4  ;;  %v959_v58 = vmul.f32 -0.5, %v4199_v38  ;;  %v1932_v60 = vadd.f32 -0.6931472, %v1592_v19  ;;  %v4202_v4 = vld [vmem:[#allocation14_spill] sm:$0xff] }
 0x173   :  { %v2217_v39 = vpop.eup %2216  ;;  %v991_v10 = vsel %vm3541_vm9, %v988_v26, %v985_v29  ;;  %vm565_vm12 = vcmp.ne.f32.partialorder %v4200_v53, %v4200_v53  ;;  %v971_v46 = vand.u32 2147483647, %v4195_v25  ;;  %2220 = vlog2.f32 %v956_v55 }
 0x174   :  { %v1527_v24 = vadd.f32 %v991_v10, %v503_v9  ;;  %v976_v16 = vmul.f32 0.6931472, %v2217_v39  ;;  %v979_v32 = vmul.f32 %v4193_v3, %v978_v14  ;;  %v960_v49 = vadd.f32 1.0, %v959_v58  ;;  %1745 = vmatpush.msrb.mxu1 %v1932_v60 }
 0x175   :  { %vm981_vm13 = vcmp.lt.f32.partialorder %v980_v28, 0.0004427343  ;;  %v500_v59 = vmax.f32 %v4201_v1, 0.0  ;;  %v962_v51 = vand.u32 2147483647, %v4199_v38  ;;  %v947_v62 = vadd.f32 1.0, %v4202_v4 }
 0x176   :  { %v2219_v57 = vpop.eup %2218  ;;  %v1591_v42 = vsel %vm567_vm8, %v4194_v0, %v1527_v24  ;;  %v982_v29 = vsel %vm981_vm13, %v979_v32, %v976_v16  ;;  %v970_v9 = vmul.f32 %v4195_v25, %v969_v17  ;;  %v950_v3 = vmul.f32 -0.5, %v4202_v4 }
 0x177   :  { %v1931_v14 = vadd.f32 -0.6931472, %v1591_v42  ;;  %v1526_v26 = vadd.f32 %v982_v29, %v502_v30  ;;  %v967_v28 = vmul.f32 0.6931472, %v2219_v57  ;;  %2222 = vlog2.f32 %v947_v62  ;;  %v4203_v57 = vld [vmem:[#allocation3_spill] sm:$0xff] }
 0x178   :  { %vm972_vm14 = vcmp.lt.f32.partialorder %v971_v46, 0.0004427343  ;;  %vm564_vm15 = vcmp.ne.f32.partialorder %v4201_v1, %v4201_v1  ;;  %v961_v55 = vmul.f32 %v4199_v38, %v960_v49  ;;  %v953_v19 = vand.u32 2147483647, %v4202_v4 }
 0x179   :  { %v2221_v58 = vpop.eup %2220  ;;  %1746 = vmatpush.msrb.mxu1 %v1931_v14  ;;  %v1590_v0 = vsel %vm566_vm10, %v4198_v11, %v1526_v26  ;;  %v973_v25 = vsel %vm972_vm14, %v970_v9, %v967_v28  ;;  %v1505_v30 = vadd.f32 1.0, %v3383_v50  ;;  %v1508_v17 = vmul.f32 -0.5, %v3383_v50 }
 0x17a   :  { %v1930_v39 = vadd.f32 -0.6931472, %v1590_v0  ;;  %v1525_v60 = vadd.f32 %v973_v25, %v501_v37  ;;  %v958_v10 = vmul.f32 0.6931472, %v2221_v58  ;;  %v951_v46 = vadd.f32 1.0, %v950_v3 }
 0x17b   :  { %vm963_vm0 = vcmp.lt.f32.partialorder %v962_v51, 0.0004427343  ;;  %v1650_v38 = vsel %vm626_vm11, %v3336_v27, %v3465_v22  ;;  %2224 = vlog2.f32 %v1505_v30  ;;  %v1509_v24 = vadd.f32 1.0, %v1508_v17 }
 0x17c   :  { %1747 = vmatpush.msrb.mxu1 %v1930_v39  ;;  %v1589_v11 = vsel %vm565_vm12, %v4200_v53, %v1525_v60  ;;  %v964_v16 = vsel %vm963_vm0, %v961_v55, %v958_v10  ;;  %v1496_v37 = vadd.f32 1.0, %v3367_v15  ;;  %v1499_v32 = vmul.f32 -0.5, %v3367_v15 }
 0x17d   :  { %v2223_v49 = vpop.eup %2222  ;;  %v1929_v51 = vadd.f32 -0.6931472, %v1589_v11  ;;  %v1524_v62 = vadd.f32 %v964_v16, %v500_v59  ;;  %v499_v42 = vmax.f32 %v4203_v57, 0.0  ;;  %vm563_vm1 = vcmp.ne.f32.partialorder %v4203_v57, %v4203_v57 }
 0x17e   :  { %v949_v27 = vmul.f32 0.6931472, %v2223_v49  ;;  %v952_v22 = vmul.f32 %v4202_v4, %v951_v46  ;;  %vm954_vm2 = vcmp.lt.f32.partialorder %v953_v19, 0.0004427343  ;;  %2226 = vlog2.f32 %v1496_v37 }
 0x17f   :  { %1748 = vmatpush.msrb.mxu1 %v1929_v51  ;;  %v1588_v53 = vsel %vm564_vm15, %v4201_v1, %v1524_v62  ;;  %v1990_v29 = vadd.f32 -0.6931472, %v1650_v38  ;;  %v1511_v9 = vand.u32 2147483647, %v3383_v50  ;;  %v1253_v59 = vadd.f32 1.0, %v3461_v7 }
 0x180   :  { %v1928_v3 = vadd.f32 -0.6931472, %v1588_v53  ;;  %v955_v14 = vsel %vm954_vm2, %v952_v22, %v949_v27  ;;  %v1510_v26 = vmul.f32 %v3383_v50, %v1509_v24  ;;  %v1500_v28 = vadd.f32 1.0, %v1499_v32 }
 0x181   :  { %v2225_v55 = vpop.eup %2224  ;;  %v1523_v4 = vadd.f32 %v955_v14, %v499_v42  ;;  %v1502_v19 = vand.u32 2147483647, %v3367_v15  ;;  %2228 = vlog2.f32 %v1253_v59  ;;  %v1256_v58 = vmul.f32 -0.5, %v3461_v7 }
 0x182   :  { %1749 = vmatpush.msrb.mxu1 %v1928_v3  ;;  %v1507_v0 = vmul.f32 0.6931472, %v2225_v55  ;;  %v1259_v1 = vand.u32 2147483647, %v3461_v7  ;;  %v1487_v25 = vadd.f32 1.0, %v3359_v54  ;;  %v1490_v30 = vmul.f32 -0.5, %v3359_v54 }
 0x183   :  { %v1587_v50 = vsel %vm563_vm1, %v4203_v57, %v1523_v4  ;;  %vm625_vm3 = vcmp.ne.f32.partialorder %v3298_v43, %v3298_v43  ;;  %vm1512_vm4 = vcmp.lt.f32.partialorder %v1511_v9, 0.0004427343  ;;  %v1257_v17 = vadd.f32 1.0, %v1256_v58 }
 0x184   :  { %v2227_v39 = vpop.eup %2226  ;;  %v1927_v60 = vadd.f32 -0.6931472, %v1587_v50  ;;  %v1513_v10 = vsel %vm1512_vm4, %v1510_v26, %v1507_v0  ;;  %v533_v46 = vmax.f32 %v3370_v2, 0.0  ;;  %2230 = vlog2.f32 %v1487_v25 }
 0x185   :  { %v4204_v38 = vmax.f32 %v3298_v43, 0.0  ;;  %v1498_v11 = vmul.f32 0.6931472, %v2227_v39  ;;  %v1501_v16 = vmul.f32 %v3367_v15, %v1500_v28  ;;  %vm1503_vm5 = vcmp.lt.f32.partialorder %v1502_v19, 0.0004427343 }
 0x186   :  { %1750 = vmatpush.msrb.mxu1 %v1927_v60  ;;  %v1258_v37 = vmul.f32 %v3461_v7, %v1257_v17  ;;  %vm3623_vm6 = vcmp.lt.f32.partialorder %v1259_v1, 0.0004427343  ;;  %v1491_v49 = vadd.f32 1.0, %v1490_v30  ;;  %v1244_v51 = vadd.f32 1.0, %v3407_v33 }
 0x187   :  { %v1585_v24 = vadd.f32 %v1513_v10, %v4204_v38  ;;  %v2229_v62 = vpop.eup %2228  ;;  %v1504_v42 = vsel %vm1503_vm5, %v1501_v16, %v1498_v11  ;;  %v1493_v15 = vand.u32 2147483647, %v3359_v54  ;;  %v1247_v27 = vmul.f32 -0.5, %v3407_v33 }
 0x188   :  { %1795 = vmatpush.msra.mxu1 %v1990_v29  ;;  %v4207_v22 = vmax.f32 %v3274_v44, 0.0  ;;  %v1255_v9 = vmul.f32 0.6931472, %v2229_v62  ;;  %2232 = vlog2.f32 %v1244_v51  ;;  %vm624_vm7 = vcmp.ne.f32.partialorder %v3274_v44, %v3274_v44 }
 0x189   :  { %v1649_v57 = vsel %vm625_vm3, %v3298_v43, %v1585_v24  ;;  %vm597_vm8 = vcmp.ne.f32.partialorder %v3370_v2, %v3370_v2  ;;  %v1248_v29 = vadd.f32 1.0, %v1247_v27  ;;  %v1478_v43 = vadd.f32 1.0, %v3355_v13 }
 0x18a   :  { %v1989_v7 = vadd.f32 -0.6931472, %v1649_v57  ;;  %v1584_v53 = vadd.f32 %v1504_v42, %v4207_v22  ;;  %v2231_v59 = vpop.eup %2230  ;;  %v1261_v14 = vsel %vm3623_vm6, %v1258_v37, %v1255_v9  ;;  %v1492_v26 = vmul.f32 %v3359_v54, %v1491_v49 }
 0x18b   :  { %v1250_v28 = vand.u32 2147483647, %v3407_v33  ;;  %v1557_v4 = vadd.f32 %v1261_v14, %v533_v46  ;;  %v1489_v19 = vmul.f32 0.6931472, %v2231_v59  ;;  %v1481_v58 = vmul.f32 -0.5, %v3355_v13 }
 0x18c   :  { %1796 = vmatpush.msra.mxu1 %v1989_v7  ;;  %v1648_v3 = vsel %vm624_vm7, %v3274_v44, %v1584_v53  ;;  %vm1494_vm9 = vcmp.lt.f32.partialorder %v1493_v15, 0.0004427343  ;;  %v532_v0 = vmax.f32 %v3323_v6, 0.0  ;;  %2234 = vlog2.f32 %v1478_v43 }
 0x18d   :  { %v1988_v55 = vadd.f32 -0.6931472, %v1648_v3  ;;  %v1484_v1 = vand.u32 2147483647, %v3355_v13  ;;  %v1621_v44 = vsel %vm597_vm8, %v3370_v2, %v1557_v4  ;;  %v1495_v54 = vsel %vm1494_vm9, %v1492_v26, %v1489_v19 }
 0x18e   :  { %v1249_v25 = vmul.f32 %v3407_v33, %v1248_v29  ;;  %v1127_v30 = vadd.f32 1.0, %v3476_v5  ;;  %v2233_v50 = vpop.eup %2232  ;;  %v1961_v17 = vadd.f32 -0.6931472, %v1621_v44  ;;  %v4208_v39 = vmax.f32 %v3171_v63, 0.0 }
 0x18f   :  { %1797 = vmatpush.msra.mxu1 %v1988_v55  ;;  %vm3657_vm10 = vcmp.lt.f32.partialorder %v1250_v28, 0.0004427343  ;;  %v1130_v46 = vmul.f32 -0.5, %v3476_v5  ;;  %vm623_vm11 = vcmp.ne.f32.partialorder %v3171_v63, %v3171_v63  ;;  %v1246_v2 = vmul.f32 0.6931472, %v2233_v50 }
 0x190   :  { %v1583_v60 = vadd.f32 %v1495_v54, %v4208_v39  ;;  %v1482_v38 = vadd.f32 1.0, %v1481_v58  ;;  %2236 = vlog2.f32 %v1127_v30  ;;  %1788 = vmatpush.msrb.mxu3 %v1961_v17  ;;  %vm596_vm12 = vcmp.ne.f32.partialorder %v3323_v6, %v3323_v6 }
 0x191   :  { %vm622_vm13 = vcmp.ne.f32.partialorder %v3042_v36, %v3042_v36  ;;  %v1235_v24 = vadd.f32 1.0, %v3378_v56  ;;  %v1252_v16 = vsel %vm3657_vm10, %v1249_v25, %v1246_v2  ;;  %vm3672_vm14 = vcmp.lt.f32.partialorder %v1484_v1, 0.0004427343 }
 0x192   :  { %v1647_v33 = vsel %vm623_vm11, %v3171_v63, %v1583_v60  ;;  %v1238_v32 = vmul.f32 -0.5, %v3378_v56  ;;  %v2235_v49 = vpop.eup %2234  ;;  %v1556_v63 = vadd.f32 %v1252_v16, %v532_v0  ;;  %v1131_v51 = vadd.f32 1.0, %v1130_v46 }
 0x193   :  { %v1987_v11 = vadd.f32 -0.6931472, %v1647_v33  ;;  %v1133_v62 = vand.u32 2147483647, %v3476_v5  ;;  %2238 = vlog2.f32 %v1235_v24  ;;  %v1480_v57 = vmul.f32 0.6931472, %v2235_v49 }
 0x194   :  { %v1483_v42 = vmul.f32 %v3355_v13, %v1482_v38  ;;  %v1239_v15 = vadd.f32 1.0, %v1238_v32  ;;  %v1469_v27 = vadd.f32 1.0, %v3351_v47  ;;  %v1620_v7 = vsel %vm596_vm12, %v3323_v6, %v1556_v63 }
 0x195   :  { %1798 = vmatpush.msra.mxu1 %v1987_v11  ;;  %v519_v22 = vmax.f32 %v3400_v18, 0.0  ;;  %v1241_v53 = vand.u32 2147483647, %v3378_v56  ;;  %v1472_v9 = vmul.f32 -0.5, %v3351_v47  ;;  %v1960_v43 = vadd.f32 -0.6931472, %v1620_v7 }
 0x196   :  { %v2237_v29 = vpop.eup %2236  ;;  %v1486_v59 = vsel %vm3672_vm14, %v1483_v42, %v1480_v57  ;;  %v531_v13 = vmax.f32 %v3292_v61, 0.0  ;;  %2240 = vlog2.f32 %v1469_v27  ;;  %v4213_v3 = vmax.f32 %v3042_v36, 0.0 }
 0x197   :  { %v1129_v26 = vmul.f32 0.6931472, %v2237_v29  ;;  %v1132_v6 = vmul.f32 %v3476_v5, %v1131_v51  ;;  %vm1134_vm15 = vcmp.lt.f32.partialorder %v1133_v62, 0.0004427343  ;;  %1789 = vmatpush.msrb.mxu3 %v1960_v43  ;;  %v1240_v28 = vmul.f32 %v3378_v56, %v1239_v15 }
 0x198   :  { %v1582_v14 = vadd.f32 %v1486_v59, %v4213_v3  ;;  %v1473_v55 = vadd.f32 1.0, %v1472_v9  ;;  %v1118_v4 = vadd.f32 1.0, %v3446_v12  ;;  %v1121_v19 = vmul.f32 -0.5, %v3446_v12 }
 0x199   :  { %v2239_v58 = vpop.eup %2238  ;;  %v1135_v1 = vsel %vm1134_vm15, %v1132_v6, %v1129_v26  ;;  %vm3700_vm0 = vcmp.lt.f32.partialorder %v1241_v53, 0.0004427343  ;;  %v1475_v5 = vand.u32 2147483647, %v3351_v47  ;;  %vm583_vm1 = vcmp.ne.f32.partialorder %v3400_v18, %v3400_v18 }
 0x19a   :  { %v1646_v0 = vsel %vm622_vm13, %v3042_v36, %v1582_v14  ;;  %v1543_v56 = vadd.f32 %v1135_v1, %v519_v22  ;;  %v1237_v25 = vmul.f32 0.6931472, %v2239_v58  ;;  %2242 = vlog2.f32 %v1118_v4 }
 0x19b   :  { %v1986_v54 = vadd.f32 -0.6931472, %v1646_v0  ;;  %vm595_vm2 = vcmp.ne.f32.partialorder %v3292_v61, %v3292_v61  ;;  %vm621_vm3 = vcmp.ne.f32.partialorder %v2988_v21, %v2988_v21  ;;  %v1460_v36 = vadd.f32 1.0, %v3034_v48 }
 0x19c   :  { %v2241_v30 = vpop.eup %2240  ;;  %v1607_v50 = vsel %vm583_vm1, %v3400_v18, %v1543_v56  ;;  %v1243_v17 = vsel %vm3700_vm0, %v1240_v28, %v1237_v25  ;;  %v1474_v39 = vmul.f32 %v3351_v47, %v1473_v55  ;;  %v1122_v60 = vadd.f32 1.0, %v1121_v19 }
 0x19d   :  { %1799 = vmatpush.msra.mxu1 %v1986_v54  ;;  %v1947_v10 = vadd.f32 -0.6931472, %v1607_v50  ;;  %v1555_v46 = vadd.f32 %v1243_v17, %v531_v13  ;;  %v1471_v2 = vmul.f32 0.6931472, %v2241_v30  ;;  %v1463_v38 = vmul.f32 -0.5, %v3034_v48 }
 0x19e   :  { %vm1476_vm4 = vcmp.lt.f32.partialorder %v1475_v5, 0.0004427343  ;;  %v518_v33 = vmax.f32 %v3344_v41, 0.0  ;;  %v1124_v24 = vand.u32 2147483647, %v3446_v12  ;;  %2244 = vlog2.f32 %v1460_v36 }
 0x19f   :  { %1766 = vmatpush.msrb.mxu2 %v1947_v10  ;;  %v1619_v18 = vsel %vm595_vm2, %v3292_v61, %v1555_v46  ;;  %v1477_v11 = vsel %vm1476_vm4, %v1474_v39, %v1471_v2  ;;  %v1466_v47 = vand.u32 2147483647, %v3034_v48  ;;  %v1109_v16 = vadd.f32 1.0, %v3402_v52 }
 0x1a0   :  { %v2243_v37 = vpop.eup %2242  ;;  %v1959_v32 = vadd.f32 -0.6931472, %v1619_v18  ;;  %v4216_v49 = vmax.f32 %v2988_v21, 0.0  ;;  %vm582_vm5 = vcmp.ne.f32.partialorder %v3344_v41, %v3344_v41  ;;  %v1112_v51 = vmul.f32 -0.5, %v3402_v52 }
 0x1a1   :  { %v1120_v62 = vmul.f32 0.6931472, %v2243_v37  ;;  %v1123_v57 = vmul.f32 %v3446_v12, %v1122_v60  ;;  %v1464_v42 = vadd.f32 1.0, %v1463_v38  ;;  %2246 = vlog2.f32 %v1109_v16 }
 0x1a2   :  { %v1581_v63 = vadd.f32 %v1477_v11, %v4216_v49  ;;  %1790 = vmatpush.msrb.mxu3 %v1959_v32  ;;  %vm1125_vm6 = vcmp.lt.f32.partialorder %v1124_v24, 0.0004427343  ;;  %v1451_v15 = vadd.f32 1.0, %v3020_v40  ;;  %v1454_v27 = vmul.f32 -0.5, %v3020_v40  ;;  %v4223_v49 = vld [vmem:[#allocation52_spill] sm:$0xff] }
 0x1a3   :  { %v1126_v22 = vsel %vm1125_vm6, %v1123_v57, %v1120_v62  ;;  %vm620_vm7 = vcmp.ne.f32.partialorder %v2931_v35, %v2931_v35  ;;  %vm3739_vm8 = vcmp.lt.f32.partialorder %v1466_v47, 0.0004427343  ;;  %v1113_v29 = vadd.f32 1.0, %v1112_v51 }
 0x1a4   :  { %v1645_v61 = vsel %vm621_vm3, %v2988_v21, %v1581_v63  ;;  %v2245_v53 = vpop.eup %2244  ;;  %v1542_v9 = vadd.f32 %v1126_v22, %v518_v33  ;;  %v1115_v43 = vand.u32 2147483647, %v3402_v52  ;;  %2248 = vlog2.f32 %v1451_v15 }
 0x1a5   :  { %v1985_v7 = vadd.f32 -0.6931472, %v1645_v61  ;;  %v1462_v21 = vmul.f32 0.6931472, %v2245_v53  ;;  %v1465_v59 = vmul.f32 %v3034_v48, %v1464_v42  ;;  %v1455_v13 = vadd.f32 1.0, %v1454_v27  ;;  %v4224_v61 = vld [vmem:[#allocation46_spill] sm:$0xff] }
 0x1a6   :  { %v1457_v3 = vand.u32 2147483647, %v3020_v40  ;;  %v1606_v14 = vsel %vm582_vm5, %v3344_v41, %v1542_v9  ;;  %v517_v26 = vmax.f32 %v3307_v45, 0.0  ;;  %v1100_v6 = vadd.f32 1.0, %v3372_v34  ;;  %v4228_v53 = vld [vmem:[#allocation48_spill] sm:$0xff] }
 0x1a7   :  { %1800 = vmatpush.msra.mxu1 %v1985_v7  ;;  %v1103_v28 = vmul.f32 -0.5, %v3372_v34  ;;  %v2247_v55 = vpop.eup %2246  ;;  %v1946_v4 = vadd.f32 -0.6931472, %v1606_v14  ;;  %v1468_v19 = vsel %vm3739_vm8, %v1465_v59, %v1462_v21  ;;  %vm581_vm9 = vcmp.ne.f32.partialorder %v3307_v45, %v3307_v45 }
 0x1a8   :  { %vm619_vm10 = vcmp.ne.f32.partialorder %v2894_v23, %v2894_v23  ;;  %v4219_v48 = vmax.f32 %v2931_v35, 0.0  ;;  %v1111_v58 = vmul.f32 0.6931472, %v2247_v55  ;;  %v1114_v0 = vmul.f32 %v3402_v52, %v1113_v29 }
 0x1a9   :  { %2250 = vlog2.f32 %v1100_v6  ;;  %1767 = vmatpush.msrb.mxu2 %v1946_v4  ;;  %vm1116_vm11 = vcmp.lt.f32.partialorder %v1115_v43, 0.0004427343  ;;  %v1456_v1 = vmul.f32 %v3020_v40, %v1455_v13  ;;  %vm3763_vm12 = vcmp.lt.f32.partialorder %v1457_v3, 0.0004427343 }
 0x1aa   :  { %v1580_v41 = vadd.f32 %v1468_v19, %v4219_v48  ;;  %v1442_v5 = vadd.f32 1.0, %v3005_v20  ;;  %v2249_v54 = vpop.eup %2248  ;;  %v1117_v25 = vsel %vm1116_vm11, %v1114_v0, %v1111_v58  ;;  %v1104_v36 = vadd.f32 1.0, %v1103_v28  ;;  %v4230_v28 = vld [vmem:[#allocation45_spill] sm:$0xff] }
 0x1ab   :  { %v1445_v52 = vmul.f32 -0.5, %v3005_v20  ;;  %v1541_v50 = vadd.f32 %v1117_v25, %v517_v26  ;;  %v1453_v17 = vmul.f32 0.6931472, %v2249_v54  ;;  %v516_v40 = vmax.f32 %v3281_v31, 0.0  ;;  %v4231_v48 = vld [vmem:[#allocation41_spill] sm:$0xff]  ;;  %v4233_v25 = vld [vmem:[#allocation43_spill] sm:$0xff] }
 0x1ac   :  { %v1644_v56 = vsel %vm620_vm7, %v2931_v35, %v1580_v41  ;;  %2252 = vlog2.f32 %v1442_v5  ;;  %vm580_vm13 = vcmp.ne.f32.partialorder %v3281_v31, %v3281_v31  ;;  %v1106_v39 = vand.u32 2147483647, %v3372_v34 }
 0x1ad   :  { %v1984_v30 = vadd.f32 -0.6931472, %v1644_v56  ;;  %v1091_v60 = vadd.f32 1.0, %v3362_v8  ;;  %v1605_v35 = vsel %vm581_vm9, %v3307_v45, %v1541_v50  ;;  %v1459_v10 = vsel %vm3763_vm12, %v1456_v1, %v1453_v17  ;;  %v4232_v1 = vld [vmem:[#allocation37_spill] sm:$0xff] }
 0x1ae   :  { %v1448_v46 = vand.u32 2147483647, %v3005_v20  ;;  %v1094_v2 = vmul.f32 -0.5, %v3362_v8  ;;  %v1945_v33 = vadd.f32 -0.6931472, %v1605_v35  ;;  %v4222_v24 = vmax.f32 %v2894_v23, 0.0 }
 0x1af   :  { %1801 = vmatpush.msra.mxu1 %v1984_v30  ;;  %v2251_v38 = vpop.eup %2250  ;;  %v1446_v11 = vadd.f32 1.0, %v1445_v52  ;;  %2254 = vlog2.f32 %v1091_v60  ;;  %v1105_v16 = vmul.f32 %v3372_v34, %v1104_v36  ;;  %v1097_v45 = vand.u32 2147483647, %v3362_v8  ;;  %v4225_v34 = vld [vmem:[#allocation11_spill] sm:$0xff]  ;;  %v4236_v60 = vld [vmem:[#allocation33_spill] sm:$0xff] }
 0x1b0   :  { %v1579_v18 = vadd.f32 %v1459_v10, %v4222_v24  ;;  %v1102_v47 = vmul.f32 0.6931472, %v2251_v38  ;;  %v1095_v37 = vadd.f32 1.0, %v1094_v2  ;;  %1768 = vmatpush.msrb.mxu2 %v1945_v33  ;;  %vm1107_vm14 = vcmp.lt.f32.partialorder %v1106_v39, 0.0004427343  ;;  %v1836_v10 = vld [vmem:[%s3973_s3 + $0x78] sm:$0xff] }
 0x1b1   :  { %v1433_v63 = vadd.f32 1.0, %v4223_v49  ;;  %v1436_v51 = vmul.f32 -0.5, %v4223_v49  ;;  %vm618_vm15 = vcmp.ne.f32.partialorder %v4224_v61, %v4224_v61  ;;  %v515_v15 = vmax.f32 %v4225_v34, 0.0 }
 0x1b2   :  { %v1643_v32 = vsel %vm619_vm10, %v2894_v23, %v1579_v18  ;;  %v2253_v62 = vpop.eup %2252  ;;  %v1108_v42 = vsel %vm1107_vm14, %v1105_v16, %v1102_v47  ;;  %v1447_v22 = vmul.f32 %v3005_v20, %v1446_v11  ;;  %vm1449_vm0 = vcmp.lt.f32.partialorder %v1448_v46, 0.0004427343  ;;  %v4238_v47 = vld [vmem:[#allocation39_spill] sm:$0xff] }
 0x1b3   :  { %v1983_v57 = vadd.f32 -0.6931472, %v1643_v32  ;;  %v1540_v27 = vadd.f32 %v1108_v42, %v516_v40  ;;  %v1444_v7 = vmul.f32 0.6931472, %v2253_v62  ;;  %2256 = vlog2.f32 %v1433_v63 }
 0x1b4   :  { %v1096_v23 = vmul.f32 %v3362_v8, %v1095_v37  ;;  %vm3801_vm1 = vcmp.lt.f32.partialorder %v1097_v45, 0.0004427343  ;;  %v1424_v9 = vadd.f32 1.0, %v4228_v53  ;;  %v1437_v59 = vadd.f32 1.0, %v1436_v51  ;;  %v1835_v45 = vld [vmem:[%s3973_s3 + $0x70] sm:$0xff] }
 0x1b5   :  { %1802 = vmatpush.msra.mxu1 %v1983_v57  ;;  %v2255_v29 = vpop.eup %2254  ;;  %v1604_v43 = vsel %vm580_vm13, %v3281_v31, %v1540_v27  ;;  %v1450_v21 = vsel %vm1449_vm0, %v1447_v22, %v1444_v7  ;;  %v1427_v20 = vmul.f32 -0.5, %v4228_v53  ;;  %v4229_v3 = vmax.f32 %v4224_v61, 0.0  ;;  %v4239_v51 = vld [vmem:[#allocation29_spill] sm:$0xff]  ;;  %v4240_v57 = vld [vmem:[#allocation35_spill] sm:$0xff] }
 0x1b6   :  { %v1944_v13 = vadd.f32 -0.6931472, %v1604_v43  ;;  %v1093_v14 = vmul.f32 0.6931472, %v2255_v29  ;;  %2258 = vlog2.f32 %v1424_v9  ;;  %v1439_v26 = vand.u32 2147483647, %v4223_v49 }
 0x1b7   :  { %v1578_v8 = vadd.f32 %v1450_v21, %v4229_v3  ;;  %v1430_v6 = vand.u32 2147483647, %v4228_v53  ;;  %v1415_v55 = vadd.f32 1.0, %v4230_v28  ;;  %v1418_v4 = vmul.f32 -0.5, %v4230_v28  ;;  %v1834_v7 = vld [vmem:[%s3973_s3 + $0x68] sm:$0xff]  ;;  %v1833_v21 = vld [vmem:[%s3973_s3 + $0x60] sm:$0xff] }
 0x1b8   :  { %1769 = vmatpush.msrb.mxu2 %v1944_v13  ;;  %vm579_vm2 = vcmp.ne.f32.partialorder %v4225_v34, %v4225_v34  ;;  %v1099_v19 = vsel %vm3801_vm1, %v1096_v23, %v1093_v14  ;;  %vm617_vm3 = vcmp.ne.f32.partialorder %v4231_v48, %v4231_v48  ;;  %vm616_vm4 = vcmp.ne.f32.partialorder %v4232_v1, %v4232_v1  ;;  %v1827_v29 = vld [vmem:[%s3973_s3 + $0x30] sm:$0xff] }
 0x1b9   :  { %v1642_v31 = vsel %vm618_vm15, %v4224_v61, %v1578_v8  ;;  %v2257_v41 = vpop.eup %2256  ;;  %v1539_v0 = vadd.f32 %v1099_v19, %v515_v15  ;;  %v1428_v44 = vadd.f32 1.0, %v1427_v20  ;;  %2260 = vlog2.f32 %v1415_v55 }
 0x1ba   :  { %v1982_v58 = vadd.f32 -0.6931472, %v1642_v31  ;;  %v1435_v5 = vmul.f32 0.6931472, %v2257_v41  ;;  %v1438_v54 = vmul.f32 %v4223_v49, %v1437_v59  ;;  %v1419_v56 = vadd.f32 1.0, %v1418_v4  ;;  %v1832_v4 = vld [vmem:[%s3973_s3 + $0x58] sm:$0xff] }
 0x1bb   :  { %v1406_v36 = vadd.f32 1.0, %v4233_v25  ;;  %v1603_v52 = vsel %vm579_vm2, %v4225_v34, %v1539_v0  ;;  %vm1440_vm5 = vcmp.lt.f32.partialorder %v1439_v26, 0.0004427343  ;;  %vm3832_vm6 = vcmp.lt.f32.partialorder %v1430_v6, 0.0004427343 }
 0x1bc   :  { %1803 = vmatpush.msra.mxu1 %v1982_v58  ;;  %v1409_v50 = vmul.f32 -0.5, %v4233_v25  ;;  %v2259_v17 = vpop.eup %2258  ;;  %v1943_v40 = vadd.f32 -0.6931472, %v1603_v52  ;;  %v1441_v39 = vsel %vm1440_vm5, %v1438_v54, %v1435_v5  ;;  %vm615_vm7 = vcmp.ne.f32.partialorder %v4236_v60, %v4236_v60  ;;  %v1717_v58 = vld [vmem:[%s3974_s4] sm:$0xf] }
 0x1bd   :  { %v1421_v35 = vand.u32 2147483647, %v4230_v28  ;;  %2262 = vlog2.f32 %v1406_v36  ;;  %v4237_v46 = vmax.f32 %v4231_v48, 0.0  ;;  %v1426_v38 = vmul.f32 0.6931472, %v2259_v17 }
 0x1be   :  { %v1429_v33 = vmul.f32 %v4228_v53, %v1428_v44  ;;  %v1412_v24 = vand.u32 2147483647, %v4233_v25  ;;  %1770 = vmatpush.msrb.mxu2 %v1943_v40  ;;  %v1420_v18 = vmul.f32 %v4230_v28, %v1419_v56  ;;  %v1410_v11 = vadd.f32 1.0, %v1409_v50  ;;  %v4247_v28 = vld [vmem:[#allocation31_spill] sm:$0xff] }
 0x1bf   :  { %v1577_v2 = vadd.f32 %v1441_v39, %v4237_v46  ;;  %v1397_v16 = vadd.f32 1.0, %v4238_v47  ;;  %v1400_v37 = vmul.f32 -0.5, %v4238_v47  ;;  %v2261_v32 = vpop.eup %2260  ;;  %vm614_vm8 = vcmp.ne.f32.partialorder %v4239_v51, %v4239_v51  ;;  %v4251_v46 = vld [vmem:[#allocation26_spill] sm:$0xff] }
 0x1c0   :  { %v1432_v63 = vsel %vm3832_vm6, %v1429_v33, %v1426_v38  ;;  %v1403_v62 = vand.u32 2147483647, %v4238_v47  ;;  %v1388_v42 = vadd.f32 1.0, %v4240_v57  ;;  %1837 = vmatpush.msra.mxu2 %v1836_v10  ;;  %v4241_v34 = vmax.f32 %v4232_v1, 0.0 }
 0x1c1   :  { %v1641_v49 = vsel %vm617_vm3, %v4231_v48, %v1577_v2  ;;  %v1417_v27 = vmul.f32 0.6931472, %v2261_v32  ;;  %2264 = vlog2.f32 %v1397_v16  ;;  %vm1422_vm9 = vcmp.lt.f32.partialorder %v1421_v35, 0.0004427343 }
 0x1c2   :  { %v1981_v61 = vadd.f32 -0.6931472, %v1641_v49  ;;  %v1576_v15 = vadd.f32 %v1432_v63, %v4241_v34  ;;  %v1401_v22 = vadd.f32 1.0, %v1400_v37  ;;  %2266 = vlog2.f32 %v1388_v42  ;;  %1838 = vmatpush.msra.mxu2 %v1835_v45 }
 0x1c3   :  { %v1391_v23 = vmul.f32 -0.5, %v4240_v57  ;;  %v2263_v12 = vpop.eup %2262  ;;  %v1423_v9 = vsel %vm1422_vm9, %v1420_v18, %v1417_v27  ;;  %vm3873_vm10 = vcmp.lt.f32.partialorder %v1412_v24, 0.0004427343  ;;  %v1394_v43 = vand.u32 2147483647, %v4240_v57  ;;  %v4253_v18 = vld [vmem:[#allocation23_spill] sm:$0xff] }
 0x1c4   :  { %1804 = vmatpush.msra.mxu1 %v1981_v61  ;;  %v1640_v53 = vsel %vm616_vm4, %v4232_v1, %v1576_v15  ;;  %v4244_v20 = vmax.f32 %v4236_v60, 0.0  ;;  %v1408_v3 = vmul.f32 0.6931472, %v2263_v12  ;;  %v1411_v8 = vmul.f32 %v4233_v25, %v1410_v11  ;;  %1839 = vmatpush.msra.mxu2 %v1834_v7  ;;  %v1829_v12 = vld [vmem:[%s3973_s3 + $0x40] sm:$0xff] }
 0x1c5   :  { %v1980_v59 = vadd.f32 -0.6931472, %v1640_v53  ;;  %v1402_v14 = vmul.f32 %v4238_v47, %v1401_v22  ;;  %vm3885_vm11 = vcmp.lt.f32.partialorder %v1403_v62, 0.0004427343  ;;  %v1392_v6 = vadd.f32 1.0, %v1391_v23  ;;  %v4255_v62 = vld [vmem:[#allocation17_spill] sm:$0xff] }
 0x1c6   :  { %v1575_v13 = vadd.f32 %v1423_v9, %v4244_v20  ;;  %v1379_v55 = vadd.f32 1.0, %v4247_v28  ;;  %v1414_v19 = vsel %vm3873_vm10, %v1411_v8, %v1408_v3  ;;  %v1382_v48 = vmul.f32 -0.5, %v4247_v28  ;;  %1840 = vmatpush.msra.mxu2 %v1833_v21  ;;  %v1831_v22 = vld [vmem:[%s3973_s3 + $0x50] sm:$0xff]  ;;  %v1830_v23 = vld [vmem:[%s3973_s3 + $0x48] sm:$0xff]  ;;  %v1828_v53 = vld [vmem:[%s3973_s3 + $0x38] sm:$0xff] }
 0x1c7   :  { %1805 = vmatpush.msra.mxu1 %v1980_v59  ;;  %v1715_v41 = vlaneseq  ;;  %v2265_v0 = vpop.eup %2264  ;;  %v4248_v44 = vmax.f32 %v4239_v51, 0.0  ;;  %vm3905_vm12 = vcmp.lt.f32.partialorder %v1394_v43, 0.0004427343  ;;  %v1393_v36 = vmul.f32 %v4240_v57, %v1392_v6  ;;  %v1826_v43 = vld [vmem:[%s3973_s3 + $0x28] sm:$0xff]  ;;  %v1825_v21 = vld [vmem:[%s3973_s3 + $0x20] sm:$0xff]  ;;  %v1824_v59 = vld [vmem:[%s3973_s3 + $0x18] sm:$0xff] }
 0x1c8   :  { %v1639_v31 = vsel %vm615_vm7, %v4236_v60, %v1575_v13  ;;  %2268 = vlog2.f32 %v1379_v55  ;;  %v2267_v56 = vpop.eup %2266  ;;  %v1399_v25 = vmul.f32 0.6931472, %v2265_v0  ;;  %v1385_v52 = vand.u32 2147483647, %v4247_v28  ;;  %1841 = vmatpush.msra.mxu2 %v1832_v4  ;;  %v1823_v20 = vld [vmem:[%s3973_s3 + $0x10] sm:$0xff]  ;;  %v1822_v13 = vld [vmem:[%s3973_s3 + $0x8] sm:$0xff] }
 0x1c9   :  { %v1979_v1 = vadd.f32 -0.6931472, %v1639_v31  ;;  %v1574_v5 = vadd.f32 %v1414_v19, %v4248_v44  ;;  %v1716_v30 = vshrl.u32 %v1715_v41, 7  ;;  %v1390_v17 = vmul.f32 0.6931472, %v2267_v56  ;;  %v1821_v3 = vld [vmem:[%s3973_s3] sm:$0xff] }
 0x1ca   :  { %v1719_v40 = vperm.slane %v1717_v58, 1  ;;  %v1405_v60 = vsel %vm3885_vm11, %v1402_v14, %v1399_v25  ;;  %v1383_v35 = vadd.f32 1.0, %v1382_v48  ;;  %v1718_v10 = vperm.slane %v1717_v58, 0  ;;  %1842 = vmatpush.msra.mxu2 %v1831_v22 }
 0x1cb   :  { %1806 = vmatpush.msra.mxu1 %v1979_v1  ;;  %v1638_v50 = vsel %vm614_vm8, %v4239_v51, %v1574_v5  ;;  %v4252_v2 = vmax.f32 %v4251_v46, 0.0  ;;  %v1396_v33 = vsel %vm3905_vm12, %v1393_v36, %v1390_v17  ;;  %v1720_v24 = vperm.slane %v1717_v58, 2 }
 0x1cc   :  { %v1978_v39 = vadd.f32 -0.6931472, %v1638_v50  ;;  %vm1723_vm13 = vcmp.eq.s32.totalorder %v1719_v40, %v1716_v30  ;;  %vm613_vm14 = vcmp.ne.f32.partialorder %v4251_v46, %v4251_v46  ;;  %v4254_v11 = vmax.f32 %v4253_v18, 0.0  ;;  %1843 = vmatpush.msra.mxu2 %v1830_v23 }
 0x1cd   :  { %v1573_v38 = vadd.f32 %v1405_v60, %v4252_v2  ;;  %v2271_v16 = vmov 1.0   ;;  %vm1722_vm15 = vcmp.eq.s32.totalorder %v1718_v10, %v1716_v30  ;;  %vm612_vm0 = vcmp.ne.f32.partialorder %v4253_v18, %v4253_v18 }
 0x1ce   :  { %1807 = vmatpush.msra.mxu1 %v1978_v39  ;;  %v1572_v47 = vadd.f32 %v1396_v33, %v4254_v11  ;;  %1996 = vmatmul.msk.f32.vlgmr.msrb.gmra.mxu2 %vm1723_vm13, %v2271_v16  ;;  %v2269_v37 = vpop.eup %2268  ;;  %vm1724_vm1 = vcmp.eq.s32.totalorder %v1720_v24, %v1716_v30  ;;  %v1384_v51 = vmul.f32 %v4247_v28, %v1383_v35  ;;  %v547_v57 = vmax.f32 %v4255_v62, 0.0 }
 0x1cf   :  { %v1637_v45 = vsel %vm613_vm14, %v4251_v46, %v1573_v38  ;;  %1995 = vmatmul.msk.f32.vlgmr.msrb.gmra.mxu1 %vm1722_vm15, %v2271_v16  ;;  %v1381_v63 = vmul.f32 0.6931472, %v2269_v37  ;;  %1997 = vmatmul.msk.f32.vlgmr.msrb.gmra.mxu3 %vm1724_vm1, %v2271_v16  ;;  %vm1386_vm2 = vcmp.lt.f32.partialorder %v1385_v52, 0.0004427343  ;;  %v1721_v34 = vperm.slane %v1717_v58, 3 }
 0x1d0   :  { %v1977_v32 = vadd.f32 -0.6931472, %v1637_v45  ;;  %v1636_v49 = vsel %vm612_vm0, %v4253_v18, %v1572_v47  ;;  %vm611_vm3 = vcmp.ne.f32.partialorder %v4255_v62, %v4255_v62  ;;  %1844 = vmatpush.msra.mxu2 %v1829_v12  ;;  %v2272_v9 = vmov 0.0  }
 0x1d1   :  { %v1976_v42 = vadd.f32 -0.6931472, %v1636_v49  ;;  %v1387_v61 = vsel %vm1386_vm2, %v1384_v51, %v1381_v63  ;;  %vm1725_vm4 = vcmp.eq.s32.totalorder %v1721_v34, %v1716_v30  ;;  %24 = vst [vmem:[#allocation2] sm:$0x3] %v2272_v9  ;;  %vm1857_vm5 = vcmask 1024  }
 0x1d2   :  { %1808 = vmatpush.msra.mxu1 %v1977_v32  ;;  %v1571_v15 = vadd.f32 %v1387_v61, %v547_v57  ;;  %1845 = vmatpush.msra.mxu2 %v1828_v53 }
 0x1d4   :  { %1809 = vmatpush.msra.mxu1 %v1976_v42  ;;  %v1635_v27 = vsel %vm611_vm3, %v4255_v62, %v1571_v15  ;;  %1846 = vmatpush.msra.mxu2 %v1827_v29 }
 0x1d5   :  { %v1975_v7 = vadd.f32 -0.6931472, %v1635_v27 }
 0x1d6   :  { %1847 = vmatpush.msra.mxu2 %v1826_v43 }
 0x1d7   :  { %1810 = vmatpush.msra.mxu1 %v1975_v7 }
 0x1d8   :  { %1998 = vmatmul.msk.f32.vlgmr.msra.gmra.mxu1 %vm1725_vm4, %v2271_v16  ;;  %1848 = vmatpush.msra.mxu2 %v1825_v21  ;;  %v1734_v55 = vld [vmem:[#allocation2] sm:$0x3] }
 0x1da   :  { %1849 = vmatpush.msra.mxu2 %v1824_v59 }
 0x1dc   :  { %1850 = vmatpush.msra.mxu2 %v1823_v20 }
 0x1de   :  { %1851 = vmatpush.msra.mxu2 %v1822_v13 }
 0x1e0   :  { %1852 = vmatpush.msra.mxu2 %v1821_v3 }
 0x24c   :  { %v1752_v8 = vpop.f32.mrf.mxu1 }
 0x251   :  { %v1772_v14 = vpop.f32.mrf.mxu2 }
 0x252   :  { %v1773_v26 = vadd.f32 %v1772_v14, %v1752_v8  ;;  %v1792_v6 = vpop.f32.mrf.mxu3 }
 0x254   :  { %v1793_v28 = vadd.f32 %v1792_v6, %v1773_v26 }
 0x255   :  { %v1812_v4 = vpop.f32.mrf.mxu1 }
 0x256   :  { %v1813_v31 = vadd.f32 %v1812_v4, %v1793_v28 }
 0x258   :  { %v1815_v19 = vadd.f32 %v1813_v31, %v1734_v55 }
 0x25a   :  { %1816 = vst [vmem:[#allocation2] sm:$0x3] %v1815_v19 }
 0x261   :  { %v1820_v48 = vld [vmem:[#allocation2] sm:$0x3] }
 0x262   :  { %1853 = vmatmul.f32.vlgmr.msra.gmra.mxu2 %v1820_v48 }
 0x2e5   :  { %v1854_v41 = vpop.f32.mrf.mxu2 }
 0x2e6   :  { %1858 = vst.msk [vmem:[%s3975_s5] sm:$0x3] %vm1857_vm5, %v1854_v41 }

</bundles_post_ra>
